<compile_context>
chip_gen: v7x
topology: tpu7x:2x2x1
jax: 0.10.0
libtpu: 0.0.40
codegen_flags: <defaults>
</compile_context>

<pallas_src>
import functools

import jax
import jax.numpy as jnp
from jax.experimental import pallas as pl
from jax.experimental.pallas import tpu as pltpu


# ---------------------------------------------------------------------------
# Static sizing helpers.
# ---------------------------------------------------------------------------
def _pick_time_chunk(T, max_chunk=32):
    """Largest divisor of T that is <= max_chunk (leading dim: no (8,128) rule)."""
    if T <= max_chunk:
        return T
    for c in range(max_chunk, 0, -1):
        if T % c == 0:
            return c
    return T


def _default_vmem_limit_bytes():
    """Scoped-VMEM limit sized off the actual chip (v5e/v6e 128 MiB, v7x 64 MiB)."""
    try:
        cap = pltpu.get_tpu_info().vmem_capacity_bytes
        return int(min((cap * 3) // 4, 100 * 1024 * 1024))
    except Exception:
        return None


_VMEM_LIMIT_BYTES = _default_vmem_limit_bytes()


# ---------------------------------------------------------------------------
# Fused kernel: sequential GRU recurrence (chunked over time) + skip add
# + LayerNorm + classifier, all on VMEM-resident data.
# ---------------------------------------------------------------------------
def _gru_chunk_kernel(
    gates_ref,   # (4, TT, B, H)  gate-major x-projections [r, z, n, skip]
    h0_ref,      # (B, H)         initial hidden state
    whh_ref,     # (H, 3H) if fuse_hh else (3, H, H)
    bhh_n_ref,   # (1, H)         b_hh_n (must stay inside r*(...))
    gamma_ref,   # (1, H)         layer_norm.weight
    beta_ref,    # (1, H)         layer_norm.bias
    wfc_ref,     # (H, Npad)      classifier weight (lane-dense padded)
    bfc_ref,     # (1, Npad)      classifier bias   (lane-dense padded)
    out_ref,     # (TT, B, H)     output: LN'd features (time-major)
    logits_ref,  # (TT, B, Npad)  output: logits (time-major, padded)
    hfin_ref,    # (B, H)         output: final hidden state (resident block)
    h_carry,     # VMEM (B, H) f32: hidden state carried across chunks
    *,
    fuse_hh,
    unroll,
):
    j = pl.program_id(0)
    tt, bsz, hsz = out_ref.shape
    npad = logits_ref.shape[-1]

    @pl.when(j == 0)
    def _():
        h_carry[...] = h0_ref[...].astype(jnp.float32)

    # Hoist loop-invariant weights / broadcasts once per chunk (JAX does not
    # CSE broadcast_in_dim inside the unrolled loop).
    if fuse_hh:
        whh = whh_ref[...]                      # (H, 3H)
    else:
        whh_r = whh_ref[0]
        whh_z = whh_ref[1]
        whh_n = whh_ref[2]
    bhh_n_b = jnp.broadcast_to(bhh_n_ref[...], (bsz, hsz))

    def step(s, h_prev):
        # Only the hidden-side matmul(s) remain on the sequential critical path.
        if fuse_hh:
            gh = jnp.dot(h_prev, whh, preferred_element_type=jnp.float32)
            gh_r = gh[:, 0:hsz]
            gh_z = gh[:, hsz:2 * hsz]
            gh_n = gh[:, 2 * hsz:3 * hsz] + bhh_n_b
        else:
            gh_r = jnp.dot(h_prev, whh_r, preferred_element_type=jnp.float32)
            gh_z = jnp.dot(h_prev, whh_z, preferred_element_type=jnp.float32)
            gh_n = jnp.dot(h_prev, whh_n, preferred_element_type=jnp.float32) + bhh_n_b
        r = jax.nn.sigmoid(gates_ref[0, s] + gh_r)
        z = jax.nn.sigmoid(gates_ref[1, s] + gh_z)
        n = jnp.tanh(gates_ref[2, s] + r * gh_n)
        h_new = (1.0 - z) * n + z * h_prev      # (B, H)
        out_ref[s] = h_new                      # write straight to the output block
        return h_new

    h_last = jax.lax.fori_loop(0, tt, step, h_carry[...], unroll=unroll)
    h_carry[...] = h_last

    # Skip residual + LayerNorm in place on out_ref, once per chunk
    # (eps = 1e-5, matching nn.LayerNorm default).
    o = out_ref[...] + gates_ref[3]             # (TT, B, H)
    mean = jnp.mean(o, axis=-1, keepdims=True)
    var = jnp.mean((o - mean) ** 2, axis=-1, keepdims=True)
    o_ln = (o - mean) * jax.lax.rsqrt(var + 1e-5)
    o_ln = o_ln * gamma_ref[...] + beta_ref[...]
    out_ref[...] = o_ln.astype(out_ref.dtype)

    # Fused classifier on the VMEM-resident features (no HBM round trip).
    wfc = wfc_ref[...]
    bfc_b = jnp.broadcast_to(bfc_ref[...], (bsz, npad))

    def fc_step(s, carry):
        logits_ref[s] = (
            jnp.dot(out_ref[s], wfc, preferred_element_type=jnp.float32) + bfc_b
        ).astype(logits_ref.dtype)
        return carry

    jax.lax.fori_loop(0, tt, fc_step, 0, unroll=unroll)

    # Final hidden written only on the last chunk (resident output block).
    @pl.when(j == pl.num_programs(0) - 1)
    def _():
        hfin_ref[...] = h_last.astype(hfin_ref.dtype)


# ---------------------------------------------------------------------------
# Wrapper
# ---------------------------------------------------------------------------
@functools.partial(jax.jit, static_argnames=("time_chunk",))
def base_predictor_forward(x, params, hidden=None, *, time_chunk=None):
    """x: (B, T, D) f32. Returns (logits (B,T,N), out (B,T,H), hidden_new (1,B,H))."""
    B, T, D = x.shape
    H = params["b_skip"].shape[-1]
    N = params["b_fc"].shape[-1]
    Npad = ((N + 127) // 128) * 128             # lane-dense classifier output

    TT = int(time_chunk) if time_chunk is not None else _pick_time_chunk(T)
    assert T % TT == 0, "time_chunk must divide T"
    unroll = True if TT <= 16 else 8
    fuse_hh = (H % 128 == 0)                    # 128-aligned gate slices only

    if hidden is None:
        h0 = jnp.zeros((B, H), jnp.float32)
    else:
        h0 = hidden.reshape(B, H).astype(jnp.float32)

    xf = x.astype(jnp.float32)

    # --- One big MXU matmul for all x-side projections, emitted gate/time-major.
    # b_hh_r / b_hh_z fold into the r/z pre-activations; b_hh_n must stay inside
    # the r*(...) term so it is added in-kernel.
    b_ih, b_hh = params["b_ih"], params["b_hh"]
    w_cat4 = jnp.concatenate([params["w_ih_t"], params["w_skip_t"]], axis=1) \
                .reshape(D, 4, H)
    b_cat4 = jnp.stack(
        [
            (b_ih[:, 0:H] + b_hh[:, 0:H])[0],            # r
            (b_ih[:, H:2 * H] + b_hh[:, H:2 * H])[0],    # z
            b_ih[:, 2 * H:3 * H][0],                     # n
            params["b_skip"][0],                         # skip
        ],
        axis=0,
    ).reshape(4, 1, 1, H)
    gates = jnp.einsum("btd,dgh->gtbh", xf, w_cat4,
                       preferred_element_type=jnp.float32) + b_cat4     # (4,T,B,H)

    # Hidden-side weights: single ref either way.
    w_hh = params["w_hh_t"]                                             # (H, 3H)
    if fuse_hh:
        whh = w_hh
        whh_spec = pl.BlockSpec((H, 3 * H), lambda j: (0, 0))
    else:
        whh = jnp.stack(
            [w_hh[:, 0:H], w_hh[:, H:2 * H], w_hh[:, 2 * H:3 * H]], axis=0)  # (3,H,H)
        whh_spec = pl.BlockSpec((3, H, H), lambda j: (0, 0, 0))
    bhh_n = b_hh[:, 2 * H:3 * H]

    # Classifier weights padded to a lane-dense output width.
    w_fc = jnp.pad(params["w_fc_t"], ((0, 0), (0, Npad - N)))
    b_fc = jnp.pad(params["b_fc"], ((0, 0), (0, Npad - N)))

    grid_spec = pltpu.PrefetchScalarGridSpec(
        num_scalar_prefetch=0,
        grid=(T // TT,),
        in_specs=[
            pl.BlockSpec((4, TT, B, H), lambda j: (0, j, 0, 0)),   # gates (gate-major)
            pl.BlockSpec((B, H), lambda j: (0, 0)),                # h0
            whh_spec,                                              # W_hh
            pl.BlockSpec((1, H), lambda j: (0, 0)),                # b_hh_n
            pl.BlockSpec((1, H), lambda j: (0, 0)),                # ln gamma
            pl.BlockSpec((1, H), lambda j: (0, 0)),                # ln beta
            pl.BlockSpec((H, Npad), lambda j: (0, 0)),             # W_fc (padded)
            pl.BlockSpec((1, Npad), lambda j: (0, 0)),             # b_fc (padded)
        ],
        out_specs=[
            pl.BlockSpec((TT, B, H), lambda j: (j, 0, 0)),         # LN'd features
            pl.BlockSpec((TT, B, Npad), lambda j: (j, 0, 0)),      # logits
            pl.BlockSpec((B, H), lambda j: (0, 0)),                # final hidden
        ],
        scratch_shapes=[pltpu.VMEM((B, H), jnp.float32)],          # hidden carry
    )

    # Time axis MUST stay "arbitrary": the h_carry scratch is a sequential
    # dependency across grid steps.
    cparams = dict(dimension_semantics=("arbitrary",))
    if _VMEM_LIMIT_BYTES is not None:
        cparams["vmem_limit_bytes"] = _VMEM_LIMIT_BYTES

    out_tbh, logits_tbn, h_final = pl.pallas_call(
        functools.partial(_gru_chunk_kernel, fuse_hh=fuse_hh, unroll=unroll),
        out_shape=(
            jax.ShapeDtypeStruct((T, B, H), jnp.float32),
            jax.ShapeDtypeStruct((T, B, Npad), jnp.float32),
            jax.ShapeDtypeStruct((B, H), jnp.float32),
        ),
        grid_spec=grid_spec,
        compiler_params=pltpu.CompilerParams(**cparams),
    )(gates, h0, whh, bhh_n, params["ln_gamma"], params["ln_beta"], w_fc, b_fc)

    # Module semantics are batch-first; keep time-major end-to-end and drop
    # these two transposes if the consumer allows it.
    logits = jnp.transpose(logits_tbn[:, :, :N], (1, 0, 2))        # (B, T, N)
    out = jnp.transpose(out_tbh, (1, 0, 2))                        # (B, T, H)
    hidden_new = h_final[None, :, :]                               # (1, B, H)
    return logits, out, hidden_new


# ---------------------------------------------------------------------------
# Parameters & pure-JAX reference (PyTorch-equivalent semantics).
# ---------------------------------------------------------------------------
def init_params(key, input_dim, hidden_size, num_tokens):
    ks = jax.random.split(key, 10)
    D, H, N = input_dim, hidden_size, num_tokens
    s = 0.1
    return {
        "w_ih_t":   s * jax.random.normal(ks[0], (D, 3 * H), jnp.float32),
        "w_hh_t":   s * jax.random.normal(ks[1], (H, 3 * H), jnp.float32),
        "b_ih":     s * jax.random.normal(ks[2], (1, 3 * H), jnp.float32),
        "b_hh":     s * jax.random.normal(ks[3], (1, 3 * H), jnp.float32),
        "w_skip_t": s * jax.random.normal(ks[4], (D, H), jnp.float32),
        "b_skip":   s * jax.random.normal(ks[5], (1, H), jnp.float32),
        "ln_gamma": jnp.ones((1, H), jnp.float32),
        "ln_beta":  jnp.zeros((1, H), jnp.float32),
        "w_fc_t":   s * jax.random.normal(ks[6], (H, N), jnp.float32),
        "b_fc":     s * jax.random.normal(ks[7], (1, N), jnp.float32),
    }


def _reference_forward(x, params, hidden=None):
    """Pure-JAX reference mirroring torch semantics."""
    B, T, D = x.shape
    H = params["b_skip"].shape[-1]
    h = jnp.zeros((B, H), jnp.float32) if hidden is None else hidden.reshape(B, H)

    def step(h_prev, x_t):
        gi = x_t @ params["w_ih_t"] + params["b_ih"]
        gh = h_prev @ params["w_hh_t"] + params["b_hh"]
        i_r, i_z, i_n = gi[:, :H], gi[:, H:2 * H], gi[:, 2 * H:]
        h_r, h_z, h_n = gh[:, :H], gh[:, H:2 * H], gh[:, 2 * H:]
        r = jax.nn.sigmoid(i_r + h_r)
        z = jax.nn.sigmoid(i_z + h_z)
        n = jnp.tanh(i_n + r * h_n)
        h_new = (1 - z) * n + z * h_prev
        return h_new, h_new

    h_last, gru_out = jax.lax.scan(step, h, jnp.transpose(x, (1, 0, 2)))
    gru_out = jnp.transpose(gru_out, (1, 0, 2))
    skip = x @ params["w_skip_t"] + params["b_skip"]
    o = gru_out + skip
    mean = jnp.mean(o, axis=-1, keepdims=True)
    var = jnp.mean((o - mean) ** 2, axis=-1, keepdims=True)
    o_ln = (o - mean) * jax.lax.rsqrt(var + 1e-5) * params["ln_gamma"] + params["ln_beta"]
    logits = o_ln @ params["w_fc_t"] + params["b_fc"]
    return logits, o_ln, h_last[None]


if __name__ == "__main__":
    B, T, D, H, N = 2, 8, 16, 32, 12   # batch, seq, input_dim, hidden_size, num_tokens

    key = jax.random.PRNGKey(0)
    k_x, k_p, k_h, k_p2 = jax.random.split(key, 4)
    x = jax.random.normal(k_x, (B, T, D), jnp.float32)
    params = init_params(k_p, D, H, N)

    # Run 1: zero initial hidden, auto-picked time chunk (single chunk at T=8).
    logits, out, hidden_new = base_predictor_forward(x, params, hidden=None)
    jax.block_until_ready((logits, out, hidden_new))
    ref_logits, ref_out, ref_hidden = _reference_forward(x, params, hidden=None)
    assert logits.shape == (B, T, N)
    assert out.shape == (B, T, H)
    assert hidden_new.shape == (1, B, H)
    assert jnp.allclose(logits, ref_logits, atol=1e-4, rtol=1e-4)
    assert jnp.allclose(out, ref_out, atol=1e-4, rtol=1e-4)
    assert jnp.allclose(hidden_new, ref_hidden, atol=1e-4, rtol=1e-4)

    # Run 2: provided hidden state + multi-chunk grid (time_chunk=4 -> 2 steps)
    # exercising the cross-chunk hidden-state carry in VMEM.
    h_init = 0.1 * jax.random.normal(k_h, (1, B, H), jnp.float32)
    logits_c, out_c, hidden_c = base_predictor_forward(x, params, hidden=h_init, time_chunk=4)
    jax.block_until_ready((logits_c, out_c, hidden_c))
    ref_l2, ref_o2, ref_h2 = _reference_forward(x, params, hidden=h_init)
    assert jnp.allclose(logits_c, ref_l2, atol=1e-4, rtol=1e-4)
    assert jnp.allclose(out_c, ref_o2, atol=1e-4, rtol=1e-4)
    assert jnp.allclose(hidden_c, ref_h2, atol=1e-4, rtol=1e-4)

    # Run 3: H = 128 exercises the fused (B,H)@(H,3H) hidden-side matmul path
    # with 128-aligned gate slices.
    H2 = 128
    params2 = init_params(k_p2, D, H2, N)
    logits_f, out_f, hidden_f = base_predictor_forward(x, params2, hidden=None, time_chunk=4)
    jax.block_until_ready((logits_f, out_f, hidden_f))
    ref_lf, ref_of, ref_hf = _reference_forward(x, params2, hidden=None)
    assert jnp.allclose(logits_f, ref_lf, atol=1e-4, rtol=1e-4)
    assert jnp.allclose(out_f, ref_of, atol=1e-4, rtol=1e-4)
    assert jnp.allclose(hidden_f, ref_hf, atol=1e-4, rtol=1e-4)

    print("KERNEL_OK")
</pallas_src>

<mosaic_0001>
module attributes {stable_mosaic.version = 11 : i64} {
  func.func @_gru_chunk_kernel(%arg0: i32, %arg1: memref<4x8x2x32xf32, #tpu.memory_space<vmem>>, %arg2: memref<2x32xf32, #tpu.memory_space<vmem>>, %arg3: memref<3x32x32xf32, #tpu.memory_space<vmem>>, %arg4: memref<1x32xf32, #tpu.memory_space<vmem>>, %arg5: memref<1x32xf32, #tpu.memory_space<vmem>>, %arg6: memref<1x32xf32, #tpu.memory_space<vmem>>, %arg7: memref<32x128xf32, #tpu.memory_space<vmem>>, %arg8: memref<1x128xf32, #tpu.memory_space<vmem>>, %arg9: memref<8x2x32xf32, #tpu.memory_space<vmem>>, %arg10: memref<8x2x128xf32, #tpu.memory_space<vmem>>, %arg11: memref<2x32xf32, #tpu.memory_space<vmem>>, %arg12: memref<2x32xf32, #tpu.memory_space<vmem>>) attributes {dimension_semantics = [#tpu.dimension_semantics<arbitrary>], iteration_bounds = array<i64: 1>, scalar_prefetch = 0 : i64, scratch_operands = 1 : i64, tpu.core_type = #tpu.core_type<tc>, window_params = [{transform_indices = @transform_0, window_bounds = array<i64: 4, 8, 2, 32>}, {pipeline_mode = #tpu.pipeline_mode<synchronous>, transform_indices = @transform_1, window_bounds = array<i64: 2, 32>}, {pipeline_mode = #tpu.pipeline_mode<synchronous>, transform_indices = @transform_2, window_bounds = array<i64: 3, 32, 32>}, {pipeline_mode = #tpu.pipeline_mode<synchronous>, transform_indices = @transform_3, window_bounds = array<i64: 1, 32>}, {pipeline_mode = #tpu.pipeline_mode<synchronous>, transform_indices = @transform_4, window_bounds = array<i64: 1, 32>}, {pipeline_mode = #tpu.pipeline_mode<synchronous>, transform_indices = @transform_5, window_bounds = array<i64: 1, 32>}, {pipeline_mode = #tpu.pipeline_mode<synchronous>, transform_indices = @transform_6, window_bounds = array<i64: 32, 128>}, {pipeline_mode = #tpu.pipeline_mode<synchronous>, transform_indices = @transform_7, window_bounds = array<i64: 1, 128>}, {transform_indices = @transform_8, window_bounds = array<i64: 8, 2, 32>}, {transform_indices = @transform_9, window_bounds = array<i64: 8, 2, 128>}, {pipeline_mode = #tpu.pipeline_mode<synchronous>, transform_indices = @transform_10, window_bounds = array<i64: 2, 32>}]} {
    %c0_i32 = arith.constant 0 : i32
    %0 = arith.cmpi eq, %arg0, %c0_i32 : i32
    %1 = arith.extui %0 : i1 to i32
    %c0_i32_0 = arith.constant 0 : i32
    %2 = arith.cmpi ne, %1, %c0_i32_0 : i32
    scf.if %2 {
      %c0_222 = arith.constant 0 : index
      %c0_223 = arith.constant 0 : index
      %420 = vector.load %arg2[%c0_222, %c0_223] : memref<2x32xf32, #tpu.memory_space<vmem>>, vector<2x32xf32>
      %c0_224 = arith.constant 0 : index
      %c0_225 = arith.constant 0 : index
      %421 = vector.load %arg12[%c0_224, %c0_225] : memref<2x32xf32, #tpu.memory_space<vmem>>, vector<2x32xf32>
      tpu.vector_store %arg12[%c0_224, %c0_225], %420 {strides = array<i32>} : memref<2x32xf32, #tpu.memory_space<vmem>>, vector<2x32xf32>,
    } else {
    }
    %c0 = arith.constant 0 : index
    %c0_1 = arith.constant 0 : index
    %c0_2 = arith.constant 0 : index
    %3 = vector.load %arg3[%c0, %c0_1, %c0_2] : memref<3x32x32xf32, #tpu.memory_space<vmem>>, vector<1x32x32xf32>
    %4 = vector.shape_cast %3 : vector<1x32x32xf32> to vector<32x32xf32>
    %c1 = arith.constant 1 : index
    %c0_3 = arith.constant 0 : index
    %c0_4 = arith.constant 0 : index
    %5 = vector.load %arg3[%c1, %c0_3, %c0_4] : memref<3x32x32xf32, #tpu.memory_space<vmem>>, vector<1x32x32xf32>
    %6 = vector.shape_cast %5 : vector<1x32x32xf32> to vector<32x32xf32>
    %c2 = arith.constant 2 : index
    %c0_5 = arith.constant 0 : index
    %c0_6 = arith.constant 0 : index
    %7 = vector.load %arg3[%c2, %c0_5, %c0_6] : memref<3x32x32xf32, #tpu.memory_space<vmem>>, vector<1x32x32xf32>
    %8 = vector.shape_cast %7 : vector<1x32x32xf32> to vector<32x32xf32>
    %c0_7 = arith.constant 0 : index
    %c0_8 = arith.constant 0 : index
    %9 = vector.load %arg4[%c0_7, %c0_8] : memref<1x32xf32, #tpu.memory_space<vmem>>, vector<1x32xf32>
    %10 = vector.shape_cast %9 : vector<1x32xf32> to vector<1x32xf32>
    %11 = vector.broadcast %10 : vector<1x32xf32> to vector<2x32xf32>
    %c0_9 = arith.constant 0 : index
    %c0_10 = arith.constant 0 : index
    %12 = vector.load %arg12[%c0_9, %c0_10] : memref<2x32xf32, #tpu.memory_space<vmem>>, vector<2x32xf32>
    %c0_i32_11 = arith.constant 0 : i32
    %cst = arith.constant dense<0.000000e+00> : vector<2x32xf32>
    %13 = tpu.matmul %12, %4, %cst {dimension_numbers = #tpu.dot_dimension_numbers<[1], [0], [0], [1], [0, 0, 1, 1], [], []>} : vector<2x32xf32>, vector<32x32xf32>, vector<2x32xf32> -> vector<2x32xf32>
    %cst_12 = arith.constant dense<0.000000e+00> : vector<2x32xf32>
    %14 = tpu.matmul %12, %6, %cst_12 {dimension_numbers = #tpu.dot_dimension_numbers<[1], [0], [0], [1], [0, 0, 1, 1], [], []>} : vector<2x32xf32>, vector<32x32xf32>, vector<2x32xf32> -> vector<2x32xf32>
    %cst_13 = arith.constant dense<0.000000e+00> : vector<2x32xf32>
    %15 = tpu.matmul %12, %8, %cst_13 {dimension_numbers = #tpu.dot_dimension_numbers<[1], [0], [0], [1], [0, 0, 1, 1], [], []>} : vector<2x32xf32>, vector<32x32xf32>, vector<2x32xf32> -> vector<2x32xf32>
    %16 = arith.addf %15, %11 : vector<2x32xf32>
    %c0_14 = arith.constant 0 : index
    %17 = arith.index_cast %c0_i32_11 : i32 to index
    %c0_15 = arith.constant 0 : index
    %c0_16 = arith.constant 0 : index
    %18 = vector.load %arg1[%c0_14, %17, %c0_15, %c0_16] : memref<4x8x2x32xf32, #tpu.memory_space<vmem>>, vector<1x1x2x32xf32>
    %19 = vector.shape_cast %18 : vector<1x1x2x32xf32> to vector<2x32xf32>
    %20 = arith.addf %19, %13 : vector<2x32xf32>
    %21 = arith.negf %20 : vector<2x32xf32>
    %22 = math.exp %21 : vector<2x32xf32>
    %cst_17 = arith.constant 1.000000e+00 : f32
    %23 = vector.broadcast %cst_17 : f32 to vector<2x32xf32>
    %24 = arith.addf %23, %22 : vector<2x32xf32>
    %25 = arith.divf %23, %24 : vector<2x32xf32>
    %c1_18 = arith.constant 1 : index
    %26 = arith.index_cast %c0_i32_11 : i32 to index
    %c0_19 = arith.constant 0 : index
    %c0_20 = arith.constant 0 : index
    %27 = vector.load %arg1[%c1_18, %26, %c0_19, %c0_20] : memref<4x8x2x32xf32, #tpu.memory_space<vmem>>, vector<1x1x2x32xf32>
    %28 = vector.shape_cast %27 : vector<1x1x2x32xf32> to vector<2x32xf32>
    %29 = arith.addf %28, %14 : vector<2x32xf32>
    %30 = arith.negf %29 : vector<2x32xf32>
    %31 = math.exp %30 : vector<2x32xf32>
    %cst_21 = arith.constant 1.000000e+00 : f32
    %32 = vector.broadcast %cst_21 : f32 to vector<2x32xf32>
    %33 = arith.addf %32, %31 : vector<2x32xf32>
    %34 = arith.divf %32, %33 : vector<2x32xf32>
    %c2_22 = arith.constant 2 : index
    %35 = arith.index_cast %c0_i32_11 : i32 to index
    %c0_23 = arith.constant 0 : index
    %c0_24 = arith.constant 0 : index
    %36 = vector.load %arg1[%c2_22, %35, %c0_23, %c0_24] : memref<4x8x2x32xf32, #tpu.memory_space<vmem>>, vector<1x1x2x32xf32>
    %37 = vector.shape_cast %36 : vector<1x1x2x32xf32> to vector<2x32xf32>
    %38 = arith.mulf %25, %16 : vector<2x32xf32>
    %39 = arith.addf %37, %38 : vector<2x32xf32>
    %40 = math.tanh %39 : vector<2x32xf32>
    %cst_25 = arith.constant 1.000000e+00 : f32
    %41 = vector.broadcast %cst_25 : f32 to vector<2x32xf32>
    %42 = arith.subf %41, %34 : vector<2x32xf32>
    %43 = arith.mulf %42, %40 : vector<2x32xf32>
    %44 = arith.mulf %34, %12 : vector<2x32xf32>
    %45 = arith.addf %43, %44 : vector<2x32xf32>
    %46 = arith.index_cast %c0_i32_11 : i32 to index
    %c0_26 = arith.constant 0 : index
    %c0_27 = arith.constant 0 : index
    %47 = vector.load %arg9[%46, %c0_26, %c0_27] : memref<8x2x32xf32, #tpu.memory_space<vmem>>, vector<1x2x32xf32>
    %48 = vector.shape_cast %47 : vector<1x2x32xf32> to vector<2x32xf32>
    %49 = vector.shape_cast %45 : vector<2x32xf32> to vector<1x2x32xf32>
    tpu.vector_store %arg9[%46, %c0_26, %c0_27], %49 {strides = array<i32>} : memref<8x2x32xf32, #tpu.memory_space<vmem>>, vector<1x2x32xf32>,
    %c1_i32 = arith.constant 1 : i32
    %cst_28 = arith.constant dense<0.000000e+00> : vector<2x32xf32>
    %50 = tpu.matmul %45, %4, %cst_28 {dimension_numbers = #tpu.dot_dimension_numbers<[1], [0], [0], [1], [0, 0, 1, 1], [], []>} : vector<2x32xf32>, vector<32x32xf32>, vector<2x32xf32> -> vector<2x32xf32>
    %cst_29 = arith.constant dense<0.000000e+00> : vector<2x32xf32>
    %51 = tpu.matmul %45, %6, %cst_29 {dimension_numbers = #tpu.dot_dimension_numbers<[1], [0], [0], [1], [0, 0, 1, 1], [], []>} : vector<2x32xf32>, vector<32x32xf32>, vector<2x32xf32> -> vector<2x32xf32>
    %cst_30 = arith.constant dense<0.000000e+00> : vector<2x32xf32>
    %52 = tpu.matmul %45, %8, %cst_30 {dimension_numbers = #tpu.dot_dimension_numbers<[1], [0], [0], [1], [0, 0, 1, 1], [], []>} : vector<2x32xf32>, vector<32x32xf32>, vector<2x32xf32> -> vector<2x32xf32>
    %53 = arith.addf %52, %11 : vector<2x32xf32>
    %c0_31 = arith.constant 0 : index
    %54 = arith.index_cast %c1_i32 : i32 to index
    %c0_32 = arith.constant 0 : index
    %c0_33 = arith.constant 0 : index
    %55 = vector.load %arg1[%c0_31, %54, %c0_32, %c0_33] : memref<4x8x2x32xf32, #tpu.memory_space<vmem>>, vector<1x1x2x32xf32>
    %56 = vector.shape_cast %55 : vector<1x1x2x32xf32> to vector<2x32xf32>
    %57 = arith.addf %56, %50 : vector<2x32xf32>
    %58 = arith.negf %57 : vector<2x32xf32>
    %59 = math.exp %58 : vector<2x32xf32>
    %cst_34 = arith.constant 1.000000e+00 : f32
    %60 = vector.broadcast %cst_34 : f32 to vector<2x32xf32>
    %61 = arith.addf %60, %59 : vector<2x32xf32>
    %62 = arith.divf %60, %61 : vector<2x32xf32>
    %c1_35 = arith.constant 1 : index
    %63 = arith.index_cast %c1_i32 : i32 to index
    %c0_36 = arith.constant 0 : index
    %c0_37 = arith.constant 0 : index
    %64 = vector.load %arg1[%c1_35, %63, %c0_36, %c0_37] : memref<4x8x2x32xf32, #tpu.memory_space<vmem>>, vector<1x1x2x32xf32>
    %65 = vector.shape_cast %64 : vector<1x1x2x32xf32> to vector<2x32xf32>
    %66 = arith.addf %65, %51 : vector<2x32xf32>
    %67 = arith.negf %66 : vector<2x32xf32>
    %68 = math.exp %67 : vector<2x32xf32>
    %cst_38 = arith.constant 1.000000e+00 : f32
    %69 = vector.broadcast %cst_38 : f32 to vector<2x32xf32>
    %70 = arith.addf %69, %68 : vector<2x32xf32>
    %71 = arith.divf %69, %70 : vector<2x32xf32>
    %c2_39 = arith.constant 2 : index
    %72 = arith.index_cast %c1_i32 : i32 to index
    %c0_40 = arith.constant 0 : index
    %c0_41 = arith.constant 0 : index
    %73 = vector.load %arg1[%c2_39, %72, %c0_40, %c0_41] : memref<4x8x2x32xf32, #tpu.memory_space<vmem>>, vector<1x1x2x32xf32>
    %74 = vector.shape_cast %73 : vector<1x1x2x32xf32> to vector<2x32xf32>
    %75 = arith.mulf %62, %53 : vector<2x32xf32>
    %76 = arith.addf %74, %75 : vector<2x32xf32>
    %77 = math.tanh %76 : vector<2x32xf32>
    %cst_42 = arith.constant 1.000000e+00 : f32
    %78 = vector.broadcast %cst_42 : f32 to vector<2x32xf32>
    %79 = arith.subf %78, %71 : vector<2x32xf32>
    %80 = arith.mulf %79, %77 : vector<2x32xf32>
    %81 = arith.mulf %71, %45 : vector<2x32xf32>
    %82 = arith.addf %80, %81 : vector<2x32xf32>
    %83 = arith.index_cast %c1_i32 : i32 to index
    %c0_43 = arith.constant 0 : index
    %c0_44 = arith.constant 0 : index
    %84 = vector.load %arg9[%83, %c0_43, %c0_44] : memref<8x2x32xf32, #tpu.memory_space<vmem>>, vector<1x2x32xf32>
    %85 = vector.shape_cast %84 : vector<1x2x32xf32> to vector<2x32xf32>
    %86 = vector.shape_cast %82 : vector<2x32xf32> to vector<1x2x32xf32>
    tpu.vector_store %arg9[%83, %c0_43, %c0_44], %86 {strides = array<i32>} : memref<8x2x32xf32, #tpu.memory_space<vmem>>, vector<1x2x32xf32>,
    %c2_i32 = arith.constant 2 : i32
    %cst_45 = arith.constant dense<0.000000e+00> : vector<2x32xf32>
    %87 = tpu.matmul %82, %4, %cst_45 {dimension_numbers = #tpu.dot_dimension_numbers<[1], [0], [0], [1], [0, 0, 1, 1], [], []>} : vector<2x32xf32>, vector<32x32xf32>, vector<2x32xf32> -> vector<2x32xf32>
    %cst_46 = arith.constant dense<0.000000e+00> : vector<2x32xf32>
    %88 = tpu.matmul %82, %6, %cst_46 {dimension_numbers = #tpu.dot_dimension_numbers<[1], [0], [0], [1], [0, 0, 1, 1], [], []>} : vector<2x32xf32>, vector<32x32xf32>, vector<2x32xf32> -> vector<2x32xf32>
    %cst_47 = arith.constant dense<0.000000e+00> : vector<2x32xf32>
    %89 = tpu.matmul %82, %8, %cst_47 {dimension_numbers = #tpu.dot_dimension_numbers<[1], [0], [0], [1], [0, 0, 1, 1], [], []>} : vector<2x32xf32>, vector<32x32xf32>, vector<2x32xf32> -> vector<2x32xf32>
    %90 = arith.addf %89, %11 : vector<2x32xf32>
    %c0_48 = arith.constant 0 : index
    %91 = arith.index_cast %c2_i32 : i32 to index
    %c0_49 = arith.constant 0 : index
    %c0_50 = arith.constant 0 : index
    %92 = vector.load %arg1[%c0_48, %91, %c0_49, %c0_50] : memref<4x8x2x32xf32, #tpu.memory_space<vmem>>, vector<1x1x2x32xf32>
    %93 = vector.shape_cast %92 : vector<1x1x2x32xf32> to vector<2x32xf32>
    %94 = arith.addf %93, %87 : vector<2x32xf32>
    %95 = arith.negf %94 : vector<2x32xf32>
    %96 = math.exp %95 : vector<2x32xf32>
    %cst_51 = arith.constant 1.000000e+00 : f32
    %97 = vector.broadcast %cst_51 : f32 to vector<2x32xf32>
    %98 = arith.addf %97, %96 : vector<2x32xf32>
    %99 = arith.divf %97, %98 : vector<2x32xf32>
    %c1_52 = arith.constant 1 : index
    %100 = arith.index_cast %c2_i32 : i32 to index
    %c0_53 = arith.constant 0 : index
    %c0_54 = arith.constant 0 : index
    %101 = vector.load %arg1[%c1_52, %100, %c0_53, %c0_54] : memref<4x8x2x32xf32, #tpu.memory_space<vmem>>, vector<1x1x2x32xf32>
    %102 = vector.shape_cast %101 : vector<1x1x2x32xf32> to vector<2x32xf32>
    %103 = arith.addf %102, %88 : vector<2x32xf32>
    %104 = arith.negf %103 : vector<2x32xf32>
    %105 = math.exp %104 : vector<2x32xf32>
    %cst_55 = arith.constant 1.000000e+00 : f32
    %106 = vector.broadcast %cst_55 : f32 to vector<2x32xf32>
    %107 = arith.addf %106, %105 : vector<2x32xf32>
    %108 = arith.divf %106, %107 : vector<2x32xf32>
    %c2_56 = arith.constant 2 : index
    %109 = arith.index_cast %c2_i32 : i32 to index
    %c0_57 = arith.constant 0 : index
    %c0_58 = arith.constant 0 : index
    %110 = vector.load %arg1[%c2_56, %109, %c0_57, %c0_58] : memref<4x8x2x32xf32, #tpu.memory_space<vmem>>, vector<1x1x2x32xf32>
    %111 = vector.shape_cast %110 : vector<1x1x2x32xf32> to vector<2x32xf32>
    %112 = arith.mulf %99, %90 : vector<2x32xf32>
    %113 = arith.addf %111, %112 : vector<2x32xf32>
    %114 = math.tanh %113 : vector<2x32xf32>
    %cst_59 = arith.constant 1.000000e+00 : f32
    %115 = vector.broadcast %cst_59 : f32 to vector<2x32xf32>
    %116 = arith.subf %115, %108 : vector<2x32xf32>
    %117 = arith.mulf %116, %114 : vector<2x32xf32>
    %118 = arith.mulf %108, %82 : vector<2x32xf32>
    %119 = arith.addf %117, %118 : vector<2x32xf32>
    %120 = arith.index_cast %c2_i32 : i32 to index
    %c0_60 = arith.constant 0 : index
    %c0_61 = arith.constant 0 : index
    %121 = vector.load %arg9[%120, %c0_60, %c0_61] : memref<8x2x32xf32, #tpu.memory_space<vmem>>, vector<1x2x32xf32>
    %122 = vector.shape_cast %121 : vector<1x2x32xf32> to vector<2x32xf32>
    %123 = vector.shape_cast %119 : vector<2x32xf32> to vector<1x2x32xf32>
    tpu.vector_store %arg9[%120, %c0_60, %c0_61], %123 {strides = array<i32>} : memref<8x2x32xf32, #tpu.memory_space<vmem>>, vector<1x2x32xf32>,
    %c3_i32 = arith.constant 3 : i32
    %cst_62 = arith.constant dense<0.000000e+00> : vector<2x32xf32>
    %124 = tpu.matmul %119, %4, %cst_62 {dimension_numbers = #tpu.dot_dimension_numbers<[1], [0], [0], [1], [0, 0, 1, 1], [], []>} : vector<2x32xf32>, vector<32x32xf32>, vector<2x32xf32> -> vector<2x32xf32>
    %cst_63 = arith.constant dense<0.000000e+00> : vector<2x32xf32>
    %125 = tpu.matmul %119, %6, %cst_63 {dimension_numbers = #tpu.dot_dimension_numbers<[1], [0], [0], [1], [0, 0, 1, 1], [], []>} : vector<2x32xf32>, vector<32x32xf32>, vector<2x32xf32> -> vector<2x32xf32>
    %cst_64 = arith.constant dense<0.000000e+00> : vector<2x32xf32>
    %126 = tpu.matmul %119, %8, %cst_64 {dimension_numbers = #tpu.dot_dimension_numbers<[1], [0], [0], [1], [0, 0, 1, 1], [], []>} : vector<2x32xf32>, vector<32x32xf32>, vector<2x32xf32> -> vector<2x32xf32>
    %127 = arith.addf %126, %11 : vector<2x32xf32>
    %c0_65 = arith.constant 0 : index
    %128 = arith.index_cast %c3_i32 : i32 to index
    %c0_66 = arith.constant 0 : index
    %c0_67 = arith.constant 0 : index
    %129 = vector.load %arg1[%c0_65, %128, %c0_66, %c0_67] : memref<4x8x2x32xf32, #tpu.memory_space<vmem>>, vector<1x1x2x32xf32>
    %130 = vector.shape_cast %129 : vector<1x1x2x32xf32> to vector<2x32xf32>
    %131 = arith.addf %130, %124 : vector<2x32xf32>
    %132 = arith.negf %131 : vector<2x32xf32>
    %133 = math.exp %132 : vector<2x32xf32>
    %cst_68 = arith.constant 1.000000e+00 : f32
    %134 = vector.broadcast %cst_68 : f32 to vector<2x32xf32>
    %135 = arith.addf %134, %133 : vector<2x32xf32>
    %136 = arith.divf %134, %135 : vector<2x32xf32>
    %c1_69 = arith.constant 1 : index
    %137 = arith.index_cast %c3_i32 : i32 to index
    %c0_70 = arith.constant 0 : index
    %c0_71 = arith.constant 0 : index
    %138 = vector.load %arg1[%c1_69, %137, %c0_70, %c0_71] : memref<4x8x2x32xf32, #tpu.memory_space<vmem>>, vector<1x1x2x32xf32>
    %139 = vector.shape_cast %138 : vector<1x1x2x32xf32> to vector<2x32xf32>
    %140 = arith.addf %139, %125 : vector<2x32xf32>
    %141 = arith.negf %140 : vector<2x32xf32>
    %142 = math.exp %141 : vector<2x32xf32>
    %cst_72 = arith.constant 1.000000e+00 : f32
    %143 = vector.broadcast %cst_72 : f32 to vector<2x32xf32>
    %144 = arith.addf %143, %142 : vector<2x32xf32>
    %145 = arith.divf %143, %144 : vector<2x32xf32>
    %c2_73 = arith.constant 2 : index
    %146 = arith.index_cast %c3_i32 : i32 to index
    %c0_74 = arith.constant 0 : index
    %c0_75 = arith.constant 0 : index
    %147 = vector.load %arg1[%c2_73, %146, %c0_74, %c0_75] : memref<4x8x2x32xf32, #tpu.memory_space<vmem>>, vector<1x1x2x32xf32>
    %148 = vector.shape_cast %147 : vector<1x1x2x32xf32> to vector<2x32xf32>
    %149 = arith.mulf %136, %127 : vector<2x32xf32>
    %150 = arith.addf %148, %149 : vector<2x32xf32>
    %151 = math.tanh %150 : vector<2x32xf32>
    %cst_76 = arith.constant 1.000000e+00 : f32
    %152 = vector.broadcast %cst_76 : f32 to vector<2x32xf32>
    %153 = arith.subf %152, %145 : vector<2x32xf32>
    %154 = arith.mulf %153, %151 : vector<2x32xf32>
    %155 = arith.mulf %145, %119 : vector<2x32xf32>
    %156 = arith.addf %154, %155 : vector<2x32xf32>
    %157 = arith.index_cast %c3_i32 : i32 to index
    %c0_77 = arith.constant 0 : index
    %c0_78 = arith.constant 0 : index
    %158 = vector.load %arg9[%157, %c0_77, %c0_78] : memref<8x2x32xf32, #tpu.memory_space<vmem>>, vector<1x2x32xf32>
    %159 = vector.shape_cast %158 : vector<1x2x32xf32> to vector<2x32xf32>
    %160 = vector.shape_cast %156 : vector<2x32xf32> to vector<1x2x32xf32>
    tpu.vector_store %arg9[%157, %c0_77, %c0_78], %160 {strides = array<i32>} : memref<8x2x32xf32, #tpu.memory_space<vmem>>, vector<1x2x32xf32>,
    %c4_i32 = arith.constant 4 : i32
    %cst_79 = arith.constant dense<0.000000e+00> : vector<2x32xf32>
    %161 = tpu.matmul %156, %4, %cst_79 {dimension_numbers = #tpu.dot_dimension_numbers<[1], [0], [0], [1], [0, 0, 1, 1], [], []>} : vector<2x32xf32>, vector<32x32xf32>, vector<2x32xf32> -> vector<2x32xf32>
    %cst_80 = arith.constant dense<0.000000e+00> : vector<2x32xf32>
    %162 = tpu.matmul %156, %6, %cst_80 {dimension_numbers = #tpu.dot_dimension_numbers<[1], [0], [0], [1], [0, 0, 1, 1], [], []>} : vector<2x32xf32>, vector<32x32xf32>, vector<2x32xf32> -> vector<2x32xf32>
    %cst_81 = arith.constant dense<0.000000e+00> : vector<2x32xf32>
    %163 = tpu.matmul %156, %8, %cst_81 {dimension_numbers = #tpu.dot_dimension_numbers<[1], [0], [0], [1], [0, 0, 1, 1], [], []>} : vector<2x32xf32>, vector<32x32xf32>, vector<2x32xf32> -> vector<2x32xf32>
    %164 = arith.addf %163, %11 : vector<2x32xf32>
    %c0_82 = arith.constant 0 : index
    %165 = arith.index_cast %c4_i32 : i32 to index
    %c0_83 = arith.constant 0 : index
    %c0_84 = arith.constant 0 : index
    %166 = vector.load %arg1[%c0_82, %165, %c0_83, %c0_84] : memref<4x8x2x32xf32, #tpu.memory_space<vmem>>, vector<1x1x2x32xf32>
    %167 = vector.shape_cast %166 : vector<1x1x2x32xf32> to vector<2x32xf32>
    %168 = arith.addf %167, %161 : vector<2x32xf32>
    %169 = arith.negf %168 : vector<2x32xf32>
    %170 = math.exp %169 : vector<2x32xf32>
    %cst_85 = arith.constant 1.000000e+00 : f32
    %171 = vector.broadcast %cst_85 : f32 to vector<2x32xf32>
    %172 = arith.addf %171, %170 : vector<2x32xf32>
    %173 = arith.divf %171, %172 : vector<2x32xf32>
    %c1_86 = arith.constant 1 : index
    %174 = arith.index_cast %c4_i32 : i32 to index
    %c0_87 = arith.constant 0 : index
    %c0_88 = arith.constant 0 : index
    %175 = vector.load %arg1[%c1_86, %174, %c0_87, %c0_88] : memref<4x8x2x32xf32, #tpu.memory_space<vmem>>, vector<1x1x2x32xf32>
    %176 = vector.shape_cast %175 : vector<1x1x2x32xf32> to vector<2x32xf32>
    %177 = arith.addf %176, %162 : vector<2x32xf32>
    %178 = arith.negf %177 : vector<2x32xf32>
    %179 = math.exp %178 : vector<2x32xf32>
    %cst_89 = arith.constant 1.000000e+00 : f32
    %180 = vector.broadcast %cst_89 : f32 to vector<2x32xf32>
    %181 = arith.addf %180, %179 : vector<2x32xf32>
    %182 = arith.divf %180, %181 : vector<2x32xf32>
    %c2_90 = arith.constant 2 : index
    %183 = arith.index_cast %c4_i32 : i32 to index
    %c0_91 = arith.constant 0 : index
    %c0_92 = arith.constant 0 : index
    %184 = vector.load %arg1[%c2_90, %183, %c0_91, %c0_92] : memref<4x8x2x32xf32, #tpu.memory_space<vmem>>, vector<1x1x2x32xf32>
    %185 = vector.shape_cast %184 : vector<1x1x2x32xf32> to vector<2x32xf32>
    %186 = arith.mulf %173, %164 : vector<2x32xf32>
    %187 = arith.addf %185, %186 : vector<2x32xf32>
    %188 = math.tanh %187 : vector<2x32xf32>
    %cst_93 = arith.constant 1.000000e+00 : f32
    %189 = vector.broadcast %cst_93 : f32 to vector<2x32xf32>
    %190 = arith.subf %189, %182 : vector<2x32xf32>
    %191 = arith.mulf %190, %188 : vector<2x32xf32>
    %192 = arith.mulf %182, %156 : vector<2x32xf32>
    %193 = arith.addf %191, %192 : vector<2x32xf32>
    %194 = arith.index_cast %c4_i32 : i32 to index
    %c0_94 = arith.constant 0 : index
    %c0_95 = arith.constant 0 : index
    %195 = vector.load %arg9[%194, %c0_94, %c0_95] : memref<8x2x32xf32, #tpu.memory_space<vmem>>, vector<1x2x32xf32>
    %196 = vector.shape_cast %195 : vector<1x2x32xf32> to vector<2x32xf32>
    %197 = vector.shape_cast %193 : vector<2x32xf32> to vector<1x2x32xf32>
    tpu.vector_store %arg9[%194, %c0_94, %c0_95], %197 {strides = array<i32>} : memref<8x2x32xf32, #tpu.memory_space<vmem>>, vector<1x2x32xf32>,
    %c5_i32 = arith.constant 5 : i32
    %cst_96 = arith.constant dense<0.000000e+00> : vector<2x32xf32>
    %198 = tpu.matmul %193, %4, %cst_96 {dimension_numbers = #tpu.dot_dimension_numbers<[1], [0], [0], [1], [0, 0, 1, 1], [], []>} : vector<2x32xf32>, vector<32x32xf32>, vector<2x32xf32> -> vector<2x32xf32>
    %cst_97 = arith.constant dense<0.000000e+00> : vector<2x32xf32>
    %199 = tpu.matmul %193, %6, %cst_97 {dimension_numbers = #tpu.dot_dimension_numbers<[1], [0], [0], [1], [0, 0, 1, 1], [], []>} : vector<2x32xf32>, vector<32x32xf32>, vector<2x32xf32> -> vector<2x32xf32>
    %cst_98 = arith.constant dense<0.000000e+00> : vector<2x32xf32>
    %200 = tpu.matmul %193, %8, %cst_98 {dimension_numbers = #tpu.dot_dimension_numbers<[1], [0], [0], [1], [0, 0, 1, 1], [], []>} : vector<2x32xf32>, vector<32x32xf32>, vector<2x32xf32> -> vector<2x32xf32>
    %201 = arith.addf %200, %11 : vector<2x32xf32>
    %c0_99 = arith.constant 0 : index
    %202 = arith.index_cast %c5_i32 : i32 to index
    %c0_100 = arith.constant 0 : index
    %c0_101 = arith.constant 0 : index
    %203 = vector.load %arg1[%c0_99, %202, %c0_100, %c0_101] : memref<4x8x2x32xf32, #tpu.memory_space<vmem>>, vector<1x1x2x32xf32>
    %204 = vector.shape_cast %203 : vector<1x1x2x32xf32> to vector<2x32xf32>
    %205 = arith.addf %204, %198 : vector<2x32xf32>
    %206 = arith.negf %205 : vector<2x32xf32>
    %207 = math.exp %206 : vector<2x32xf32>
    %cst_102 = arith.constant 1.000000e+00 : f32
    %208 = vector.broadcast %cst_102 : f32 to vector<2x32xf32>
    %209 = arith.addf %208, %207 : vector<2x32xf32>
    %210 = arith.divf %208, %209 : vector<2x32xf32>
    %c1_103 = arith.constant 1 : index
    %211 = arith.index_cast %c5_i32 : i32 to index
    %c0_104 = arith.constant 0 : index
    %c0_105 = arith.constant 0 : index
    %212 = vector.load %arg1[%c1_103, %211, %c0_104, %c0_105] : memref<4x8x2x32xf32, #tpu.memory_space<vmem>>, vector<1x1x2x32xf32>
    %213 = vector.shape_cast %212 : vector<1x1x2x32xf32> to vector<2x32xf32>
    %214 = arith.addf %213, %199 : vector<2x32xf32>
    %215 = arith.negf %214 : vector<2x32xf32>
    %216 = math.exp %215 : vector<2x32xf32>
    %cst_106 = arith.constant 1.000000e+00 : f32
    %217 = vector.broadcast %cst_106 : f32 to vector<2x32xf32>
    %218 = arith.addf %217, %216 : vector<2x32xf32>
    %219 = arith.divf %217, %218 : vector<2x32xf32>
    %c2_107 = arith.constant 2 : index
    %220 = arith.index_cast %c5_i32 : i32 to index
    %c0_108 = arith.constant 0 : index
    %c0_109 = arith.constant 0 : index
    %221 = vector.load %arg1[%c2_107, %220, %c0_108, %c0_109] : memref<4x8x2x32xf32, #tpu.memory_space<vmem>>, vector<1x1x2x32xf32>
    %222 = vector.shape_cast %221 : vector<1x1x2x32xf32> to vector<2x32xf32>
    %223 = arith.mulf %210, %201 : vector<2x32xf32>
    %224 = arith.addf %222, %223 : vector<2x32xf32>
    %225 = math.tanh %224 : vector<2x32xf32>
    %cst_110 = arith.constant 1.000000e+00 : f32
    %226 = vector.broadcast %cst_110 : f32 to vector<2x32xf32>
    %227 = arith.subf %226, %219 : vector<2x32xf32>
    %228 = arith.mulf %227, %225 : vector<2x32xf32>
    %229 = arith.mulf %219, %193 : vector<2x32xf32>
    %230 = arith.addf %228, %229 : vector<2x32xf32>
    %231 = arith.index_cast %c5_i32 : i32 to index
    %c0_111 = arith.constant 0 : index
    %c0_112 = arith.constant 0 : index
    %232 = vector.load %arg9[%231, %c0_111, %c0_112] : memref<8x2x32xf32, #tpu.memory_space<vmem>>, vector<1x2x32xf32>
    %233 = vector.shape_cast %232 : vector<1x2x32xf32> to vector<2x32xf32>
    %234 = vector.shape_cast %230 : vector<2x32xf32> to vector<1x2x32xf32>
    tpu.vector_store %arg9[%231, %c0_111, %c0_112], %234 {strides = array<i32>} : memref<8x2x32xf32, #tpu.memory_space<vmem>>, vector<1x2x32xf32>,
    %c6_i32 = arith.constant 6 : i32
    %cst_113 = arith.constant dense<0.000000e+00> : vector<2x32xf32>
    %235 = tpu.matmul %230, %4, %cst_113 {dimension_numbers = #tpu.dot_dimension_numbers<[1], [0], [0], [1], [0, 0, 1, 1], [], []>} : vector<2x32xf32>, vector<32x32xf32>, vector<2x32xf32> -> vector<2x32xf32>
    %cst_114 = arith.constant dense<0.000000e+00> : vector<2x32xf32>
    %236 = tpu.matmul %230, %6, %cst_114 {dimension_numbers = #tpu.dot_dimension_numbers<[1], [0], [0], [1], [0, 0, 1, 1], [], []>} : vector<2x32xf32>, vector<32x32xf32>, vector<2x32xf32> -> vector<2x32xf32>
    %cst_115 = arith.constant dense<0.000000e+00> : vector<2x32xf32>
    %237 = tpu.matmul %230, %8, %cst_115 {dimension_numbers = #tpu.dot_dimension_numbers<[1], [0], [0], [1], [0, 0, 1, 1], [], []>} : vector<2x32xf32>, vector<32x32xf32>, vector<2x32xf32> -> vector<2x32xf32>
    %238 = arith.addf %237, %11 : vector<2x32xf32>
    %c0_116 = arith.constant 0 : index
    %239 = arith.index_cast %c6_i32 : i32 to index
    %c0_117 = arith.constant 0 : index
    %c0_118 = arith.constant 0 : index
    %240 = vector.load %arg1[%c0_116, %239, %c0_117, %c0_118] : memref<4x8x2x32xf32, #tpu.memory_space<vmem>>, vector<1x1x2x32xf32>
    %241 = vector.shape_cast %240 : vector<1x1x2x32xf32> to vector<2x32xf32>
    %242 = arith.addf %241, %235 : vector<2x32xf32>
    %243 = arith.negf %242 : vector<2x32xf32>
    %244 = math.exp %243 : vector<2x32xf32>
    %cst_119 = arith.constant 1.000000e+00 : f32
    %245 = vector.broadcast %cst_119 : f32 to vector<2x32xf32>
    %246 = arith.addf %245, %244 : vector<2x32xf32>
    %247 = arith.divf %245, %246 : vector<2x32xf32>
    %c1_120 = arith.constant 1 : index
    %248 = arith.index_cast %c6_i32 : i32 to index
    %c0_121 = arith.constant 0 : index
    %c0_122 = arith.constant 0 : index
    %249 = vector.load %arg1[%c1_120, %248, %c0_121, %c0_122] : memref<4x8x2x32xf32, #tpu.memory_space<vmem>>, vector<1x1x2x32xf32>
    %250 = vector.shape_cast %249 : vector<1x1x2x32xf32> to vector<2x32xf32>
    %251 = arith.addf %250, %236 : vector<2x32xf32>
    %252 = arith.negf %251 : vector<2x32xf32>
    %253 = math.exp %252 : vector<2x32xf32>
    %cst_123 = arith.constant 1.000000e+00 : f32
    %254 = vector.broadcast %cst_123 : f32 to vector<2x32xf32>
    %255 = arith.addf %254, %253 : vector<2x32xf32>
    %256 = arith.divf %254, %255 : vector<2x32xf32>
    %c2_124 = arith.constant 2 : index
    %257 = arith.index_cast %c6_i32 : i32 to index
    %c0_125 = arith.constant 0 : index
    %c0_126 = arith.constant 0 : index
    %258 = vector.load %arg1[%c2_124, %257, %c0_125, %c0_126] : memref<4x8x2x32xf32, #tpu.memory_space<vmem>>, vector<1x1x2x32xf32>
    %259 = vector.shape_cast %258 : vector<1x1x2x32xf32> to vector<2x32xf32>
    %260 = arith.mulf %247, %238 : vector<2x32xf32>
    %261 = arith.addf %259, %260 : vector<2x32xf32>
    %262 = math.tanh %261 : vector<2x32xf32>
    %cst_127 = arith.constant 1.000000e+00 : f32
    %263 = vector.broadcast %cst_127 : f32 to vector<2x32xf32>
    %264 = arith.subf %263, %256 : vector<2x32xf32>
    %265 = arith.mulf %264, %262 : vector<2x32xf32>
    %266 = arith.mulf %256, %230 : vector<2x32xf32>
    %267 = arith.addf %265, %266 : vector<2x32xf32>
    %268 = arith.index_cast %c6_i32 : i32 to index
    %c0_128 = arith.constant 0 : index
    %c0_129 = arith.constant 0 : index
    %269 = vector.load %arg9[%268, %c0_128, %c0_129] : memref<8x2x32xf32, #tpu.memory_space<vmem>>, vector<1x2x32xf32>
    %270 = vector.shape_cast %269 : vector<1x2x32xf32> to vector<2x32xf32>
    %271 = vector.shape_cast %267 : vector<2x32xf32> to vector<1x2x32xf32>
    tpu.vector_store %arg9[%268, %c0_128, %c0_129], %271 {strides = array<i32>} : memref<8x2x32xf32, #tpu.memory_space<vmem>>, vector<1x2x32xf32>,
    %c7_i32 = arith.constant 7 : i32
    %cst_130 = arith.constant dense<0.000000e+00> : vector<2x32xf32>
    %272 = tpu.matmul %267, %4, %cst_130 {dimension_numbers = #tpu.dot_dimension_numbers<[1], [0], [0], [1], [0, 0, 1, 1], [], []>} : vector<2x32xf32>, vector<32x32xf32>, vector<2x32xf32> -> vector<2x32xf32>
    %cst_131 = arith.constant dense<0.000000e+00> : vector<2x32xf32>
    %273 = tpu.matmul %267, %6, %cst_131 {dimension_numbers = #tpu.dot_dimension_numbers<[1], [0], [0], [1], [0, 0, 1, 1], [], []>} : vector<2x32xf32>, vector<32x32xf32>, vector<2x32xf32> -> vector<2x32xf32>
    %cst_132 = arith.constant dense<0.000000e+00> : vector<2x32xf32>
    %274 = tpu.matmul %267, %8, %cst_132 {dimension_numbers = #tpu.dot_dimension_numbers<[1], [0], [0], [1], [0, 0, 1, 1], [], []>} : vector<2x32xf32>, vector<32x32xf32>, vector<2x32xf32> -> vector<2x32xf32>
    %275 = arith.addf %274, %11 : vector<2x32xf32>
    %c0_133 = arith.constant 0 : index
    %276 = arith.index_cast %c7_i32 : i32 to index
    %c0_134 = arith.constant 0 : index
    %c0_135 = arith.constant 0 : index
    %277 = vector.load %arg1[%c0_133, %276, %c0_134, %c0_135] : memref<4x8x2x32xf32, #tpu.memory_space<vmem>>, vector<1x1x2x32xf32>
    %278 = vector.shape_cast %277 : vector<1x1x2x32xf32> to vector<2x32xf32>
    %279 = arith.addf %278, %272 : vector<2x32xf32>
    %280 = arith.negf %279 : vector<2x32xf32>
    %281 = math.exp %280 : vector<2x32xf32>
    %cst_136 = arith.constant 1.000000e+00 : f32
    %282 = vector.broadcast %cst_136 : f32 to vector<2x32xf32>
    %283 = arith.addf %282, %281 : vector<2x32xf32>
    %284 = arith.divf %282, %283 : vector<2x32xf32>
    %c1_137 = arith.constant 1 : index
    %285 = arith.index_cast %c7_i32 : i32 to index
    %c0_138 = arith.constant 0 : index
    %c0_139 = arith.constant 0 : index
    %286 = vector.load %arg1[%c1_137, %285, %c0_138, %c0_139] : memref<4x8x2x32xf32, #tpu.memory_space<vmem>>, vector<1x1x2x32xf32>
    %287 = vector.shape_cast %286 : vector<1x1x2x32xf32> to vector<2x32xf32>
    %288 = arith.addf %287, %273 : vector<2x32xf32>
    %289 = arith.negf %288 : vector<2x32xf32>
    %290 = math.exp %289 : vector<2x32xf32>
    %cst_140 = arith.constant 1.000000e+00 : f32
    %291 = vector.broadcast %cst_140 : f32 to vector<2x32xf32>
    %292 = arith.addf %291, %290 : vector<2x32xf32>
    %293 = arith.divf %291, %292 : vector<2x32xf32>
    %c2_141 = arith.constant 2 : index
    %294 = arith.index_cast %c7_i32 : i32 to index
    %c0_142 = arith.constant 0 : index
    %c0_143 = arith.constant 0 : index
    %295 = vector.load %arg1[%c2_141, %294, %c0_142, %c0_143] : memref<4x8x2x32xf32, #tpu.memory_space<vmem>>, vector<1x1x2x32xf32>
    %296 = vector.shape_cast %295 : vector<1x1x2x32xf32> to vector<2x32xf32>
    %297 = arith.mulf %284, %275 : vector<2x32xf32>
    %298 = arith.addf %296, %297 : vector<2x32xf32>
    %299 = math.tanh %298 : vector<2x32xf32>
    %cst_144 = arith.constant 1.000000e+00 : f32
    %300 = vector.broadcast %cst_144 : f32 to vector<2x32xf32>
    %301 = arith.subf %300, %293 : vector<2x32xf32>
    %302 = arith.mulf %301, %299 : vector<2x32xf32>
    %303 = arith.mulf %293, %267 : vector<2x32xf32>
    %304 = arith.addf %302, %303 : vector<2x32xf32>
    %305 = arith.index_cast %c7_i32 : i32 to index
    %c0_145 = arith.constant 0 : index
    %c0_146 = arith.constant 0 : index
    %306 = vector.load %arg9[%305, %c0_145, %c0_146] : memref<8x2x32xf32, #tpu.memory_space<vmem>>, vector<1x2x32xf32>
    %307 = vector.shape_cast %306 : vector<1x2x32xf32> to vector<2x32xf32>
    %308 = vector.shape_cast %304 : vector<2x32xf32> to vector<1x2x32xf32>
    tpu.vector_store %arg9[%305, %c0_145, %c0_146], %308 {strides = array<i32>} : memref<8x2x32xf32, #tpu.memory_space<vmem>>, vector<1x2x32xf32>,
    %c8_i32 = arith.constant 8 : i32
    %c0_147 = arith.constant 0 : index
    %c0_148 = arith.constant 0 : index
    %309 = vector.load %arg12[%c0_147, %c0_148] : memref<2x32xf32, #tpu.memory_space<vmem>>, vector<2x32xf32>
    tpu.vector_store %arg12[%c0_147, %c0_148], %304 {strides = array<i32>} : memref<2x32xf32, #tpu.memory_space<vmem>>, vector<2x32xf32>,
    %c0_149 = arith.constant 0 : index
    %c0_150 = arith.constant 0 : index
    %c0_151 = arith.constant 0 : index
    %310 = vector.load %arg9[%c0_149, %c0_150, %c0_151] : memref<8x2x32xf32, #tpu.memory_space<vmem>>, vector<8x2x32xf32>
    %c3 = arith.constant 3 : index
    %c0_152 = arith.constant 0 : index
    %c0_153 = arith.constant 0 : index
    %c0_154 = arith.constant 0 : index
    %311 = vector.load %arg1[%c3, %c0_152, %c0_153, %c0_154] : memref<4x8x2x32xf32, #tpu.memory_space<vmem>>, vector<1x8x2x32xf32>
    %312 = vector.shape_cast %311 : vector<1x8x2x32xf32> to vector<8x2x32xf32>
    %313 = arith.addf %310, %312 : vector<8x2x32xf32>
    %cst_155 = arith.constant dense<0.000000e+00> : vector<8x2xf32>
    %314 = vector.multi_reduction <add>, %313, %cst_155 [2] : vector<8x2x32xf32> to vector<8x2xf32>
    %315 = vector.shape_cast %314 : vector<8x2xf32> to vector<8x2x1xf32>
    %cst_156 = arith.constant 3.200000e+01 : f32
    %316 = vector.broadcast %cst_156 : f32 to vector<8x2x1xf32>
    %317 = arith.divf %315, %316 : vector<8x2x1xf32>
    %318 = vector.broadcast %317 : vector<8x2x1xf32> to vector<8x2x32xf32>
    %319 = arith.subf %313, %318 : vector<8x2x32xf32>
    %320 = arith.mulf %319, %319 : vector<8x2x32xf32>
    %cst_157 = arith.constant dense<0.000000e+00> : vector<8x2xf32>
    %321 = vector.multi_reduction <add>, %320, %cst_157 [2] : vector<8x2x32xf32> to vector<8x2xf32>
    %322 = vector.shape_cast %321 : vector<8x2xf32> to vector<8x2x1xf32>
    %cst_158 = arith.constant 3.200000e+01 : f32
    %323 = vector.broadcast %cst_158 : f32 to vector<8x2x1xf32>
    %324 = arith.divf %322, %323 : vector<8x2x1xf32>
    %325 = vector.broadcast %317 : vector<8x2x1xf32> to vector<8x2x32xf32>
    %326 = arith.subf %313, %325 : vector<8x2x32xf32>
    %cst_159 = arith.constant 9.99999974E-6 : f32
    %327 = vector.broadcast %cst_159 : f32 to vector<8x2x1xf32>
    %328 = arith.addf %324, %327 : vector<8x2x1xf32>
    %329 = math.rsqrt %328 : vector<8x2x1xf32>
    %330 = vector.broadcast %329 : vector<8x2x1xf32> to vector<8x2x32xf32>
    %331 = arith.mulf %326, %330 : vector<8x2x32xf32>
    %c0_160 = arith.constant 0 : index
    %c0_161 = arith.constant 0 : index
    %332 = vector.load %arg5[%c0_160, %c0_161] : memref<1x32xf32, #tpu.memory_space<vmem>>, vector<1x32xf32>
    %333 = vector.shape_cast %332 : vector<1x32xf32> to vector<1x1x32xf32>
    %334 = vector.broadcast %333 : vector<1x1x32xf32> to vector<8x2x32xf32>
    %335 = arith.mulf %331, %334 : vector<8x2x32xf32>
    %c0_162 = arith.constant 0 : index
    %c0_163 = arith.constant 0 : index
    %336 = vector.load %arg6[%c0_162, %c0_163] : memref<1x32xf32, #tpu.memory_space<vmem>>, vector<1x32xf32>
    %337 = vector.shape_cast %336 : vector<1x32xf32> to vector<1x1x32xf32>
    %338 = vector.broadcast %337 : vector<1x1x32xf32> to vector<8x2x32xf32>
    %339 = arith.addf %335, %338 : vector<8x2x32xf32>
    %c0_164 = arith.constant 0 : index
    %c0_165 = arith.constant 0 : index
    %c0_166 = arith.constant 0 : index
    %340 = vector.load %arg9[%c0_164, %c0_165, %c0_166] : memref<8x2x32xf32, #tpu.memory_space<vmem>>, vector<8x2x32xf32>
    tpu.vector_store %arg9[%c0_164, %c0_165, %c0_166], %339 {strides = array<i32>} : memref<8x2x32xf32, #tpu.memory_space<vmem>>, vector<8x2x32xf32>,
    %c0_167 = arith.constant 0 : index
    %c0_168 = arith.constant 0 : index
    %341 = vector.load %arg7[%c0_167, %c0_168] : memref<32x128xf32, #tpu.memory_space<vmem>>, vector<32x128xf32>
    %c0_169 = arith.constant 0 : index
    %c0_170 = arith.constant 0 : index
    %342 = vector.load %arg8[%c0_169, %c0_170] : memref<1x128xf32, #tpu.memory_space<vmem>>, vector<1x128xf32>
    %343 = vector.shape_cast %342 : vector<1x128xf32> to vector<1x128xf32>
    %344 = vector.broadcast %343 : vector<1x128xf32> to vector<2x128xf32>
    %c0_i32_171 = arith.constant 0 : i32
    %345 = arith.index_cast %c0_i32_171 : i32 to index
    %c0_172 = arith.constant 0 : index
    %c0_173 = arith.constant 0 : index
    %346 = vector.load %arg9[%345, %c0_172, %c0_173] : memref<8x2x32xf32, #tpu.memory_space<vmem>>, vector<1x2x32xf32>
    %347 = vector.shape_cast %346 : vector<1x2x32xf32> to vector<2x32xf32>
    %cst_174 = arith.constant dense<0.000000e+00> : vector<2x128xf32>
    %348 = tpu.matmul %347, %341, %cst_174 {dimension_numbers = #tpu.dot_dimension_numbers<[1], [0], [0], [1], [0, 0, 1, 1], [], []>} : vector<2x32xf32>, vector<32x128xf32>, vector<2x128xf32> -> vector<2x128xf32>
    %349 = arith.addf %348, %344 : vector<2x128xf32>
    %350 = arith.index_cast %c0_i32_171 : i32 to index
    %c0_175 = arith.constant 0 : index
    %c0_176 = arith.constant 0 : index
    %351 = vector.load %arg10[%350, %c0_175, %c0_176] : memref<8x2x128xf32, #tpu.memory_space<vmem>>, vector<1x2x128xf32>
    %352 = vector.shape_cast %351 : vector<1x2x128xf32> to vector<2x128xf32>
    %353 = vector.shape_cast %349 : vector<2x128xf32> to vector<1x2x128xf32>
    tpu.vector_store %arg10[%350, %c0_175, %c0_176], %353 {strides = array<i32>} : memref<8x2x128xf32, #tpu.memory_space<vmem>>, vector<1x2x128xf32>,
    %c1_i32_177 = arith.constant 1 : i32
    %354 = arith.index_cast %c1_i32_177 : i32 to index
    %c0_178 = arith.constant 0 : index
    %c0_179 = arith.constant 0 : index
    %355 = vector.load %arg9[%354, %c0_178, %c0_179] : memref<8x2x32xf32, #tpu.memory_space<vmem>>, vector<1x2x32xf32>
    %356 = vector.shape_cast %355 : vector<1x2x32xf32> to vector<2x32xf32>
    %cst_180 = arith.constant dense<0.000000e+00> : vector<2x128xf32>
    %357 = tpu.matmul %356, %341, %cst_180 {dimension_numbers = #tpu.dot_dimension_numbers<[1], [0], [0], [1], [0, 0, 1, 1], [], []>} : vector<2x32xf32>, vector<32x128xf32>, vector<2x128xf32> -> vector<2x128xf32>
    %358 = arith.addf %357, %344 : vector<2x128xf32>
    %359 = arith.index_cast %c1_i32_177 : i32 to index
    %c0_181 = arith.constant 0 : index
    %c0_182 = arith.constant 0 : index
    %360 = vector.load %arg10[%359, %c0_181, %c0_182] : memref<8x2x128xf32, #tpu.memory_space<vmem>>, vector<1x2x128xf32>
    %361 = vector.shape_cast %360 : vector<1x2x128xf32> to vector<2x128xf32>
    %362 = vector.shape_cast %358 : vector<2x128xf32> to vector<1x2x128xf32>
    tpu.vector_store %arg10[%359, %c0_181, %c0_182], %362 {strides = array<i32>} : memref<8x2x128xf32, #tpu.memory_space<vmem>>, vector<1x2x128xf32>,
    %c2_i32_183 = arith.constant 2 : i32
    %363 = arith.index_cast %c2_i32_183 : i32 to index
    %c0_184 = arith.constant 0 : index
    %c0_185 = arith.constant 0 : index
    %364 = vector.load %arg9[%363, %c0_184, %c0_185] : memref<8x2x32xf32, #tpu.memory_space<vmem>>, vector<1x2x32xf32>
    %365 = vector.shape_cast %364 : vector<1x2x32xf32> to vector<2x32xf32>
    %cst_186 = arith.constant dense<0.000000e+00> : vector<2x128xf32>
    %366 = tpu.matmul %365, %341, %cst_186 {dimension_numbers = #tpu.dot_dimension_numbers<[1], [0], [0], [1], [0, 0, 1, 1], [], []>} : vector<2x32xf32>, vector<32x128xf32>, vector<2x128xf32> -> vector<2x128xf32>
    %367 = arith.addf %366, %344 : vector<2x128xf32>
    %368 = arith.index_cast %c2_i32_183 : i32 to index
    %c0_187 = arith.constant 0 : index
    %c0_188 = arith.constant 0 : index
    %369 = vector.load %arg10[%368, %c0_187, %c0_188] : memref<8x2x128xf32, #tpu.memory_space<vmem>>, vector<1x2x128xf32>
    %370 = vector.shape_cast %369 : vector<1x2x128xf32> to vector<2x128xf32>
    %371 = vector.shape_cast %367 : vector<2x128xf32> to vector<1x2x128xf32>
    tpu.vector_store %arg10[%368, %c0_187, %c0_188], %371 {strides = array<i32>} : memref<8x2x128xf32, #tpu.memory_space<vmem>>, vector<1x2x128xf32>,
    %c3_i32_189 = arith.constant 3 : i32
    %372 = arith.index_cast %c3_i32_189 : i32 to index
    %c0_190 = arith.constant 0 : index
    %c0_191 = arith.constant 0 : index
    %373 = vector.load %arg9[%372, %c0_190, %c0_191] : memref<8x2x32xf32, #tpu.memory_space<vmem>>, vector<1x2x32xf32>
    %374 = vector.shape_cast %373 : vector<1x2x32xf32> to vector<2x32xf32>
    %cst_192 = arith.constant dense<0.000000e+00> : vector<2x128xf32>
    %375 = tpu.matmul %374, %341, %cst_192 {dimension_numbers = #tpu.dot_dimension_numbers<[1], [0], [0], [1], [0, 0, 1, 1], [], []>} : vector<2x32xf32>, vector<32x128xf32>, vector<2x128xf32> -> vector<2x128xf32>
    %376 = arith.addf %375, %344 : vector<2x128xf32>
    %377 = arith.index_cast %c3_i32_189 : i32 to index
    %c0_193 = arith.constant 0 : index
    %c0_194 = arith.constant 0 : index
    %378 = vector.load %arg10[%377, %c0_193, %c0_194] : memref<8x2x128xf32, #tpu.memory_space<vmem>>, vector<1x2x128xf32>
    %379 = vector.shape_cast %378 : vector<1x2x128xf32> to vector<2x128xf32>
    %380 = vector.shape_cast %376 : vector<2x128xf32> to vector<1x2x128xf32>
    tpu.vector_store %arg10[%377, %c0_193, %c0_194], %380 {strides = array<i32>} : memref<8x2x128xf32, #tpu.memory_space<vmem>>, vector<1x2x128xf32>,
    %c4_i32_195 = arith.constant 4 : i32
    %381 = arith.index_cast %c4_i32_195 : i32 to index
    %c0_196 = arith.constant 0 : index
    %c0_197 = arith.constant 0 : index
    %382 = vector.load %arg9[%381, %c0_196, %c0_197] : memref<8x2x32xf32, #tpu.memory_space<vmem>>, vector<1x2x32xf32>
    %383 = vector.shape_cast %382 : vector<1x2x32xf32> to vector<2x32xf32>
    %cst_198 = arith.constant dense<0.000000e+00> : vector<2x128xf32>
    %384 = tpu.matmul %383, %341, %cst_198 {dimension_numbers = #tpu.dot_dimension_numbers<[1], [0], [0], [1], [0, 0, 1, 1], [], []>} : vector<2x32xf32>, vector<32x128xf32>, vector<2x128xf32> -> vector<2x128xf32>
    %385 = arith.addf %384, %344 : vector<2x128xf32>
    %386 = arith.index_cast %c4_i32_195 : i32 to index
    %c0_199 = arith.constant 0 : index
    %c0_200 = arith.constant 0 : index
    %387 = vector.load %arg10[%386, %c0_199, %c0_200] : memref<8x2x128xf32, #tpu.memory_space<vmem>>, vector<1x2x128xf32>
    %388 = vector.shape_cast %387 : vector<1x2x128xf32> to vector<2x128xf32>
    %389 = vector.shape_cast %385 : vector<2x128xf32> to vector<1x2x128xf32>
    tpu.vector_store %arg10[%386, %c0_199, %c0_200], %389 {strides = array<i32>} : memref<8x2x128xf32, #tpu.memory_space<vmem>>, vector<1x2x128xf32>,
    %c5_i32_201 = arith.constant 5 : i32
    %390 = arith.index_cast %c5_i32_201 : i32 to index
    %c0_202 = arith.constant 0 : index
    %c0_203 = arith.constant 0 : index
    %391 = vector.load %arg9[%390, %c0_202, %c0_203] : memref<8x2x32xf32, #tpu.memory_space<vmem>>, vector<1x2x32xf32>
    %392 = vector.shape_cast %391 : vector<1x2x32xf32> to vector<2x32xf32>
    %cst_204 = arith.constant dense<0.000000e+00> : vector<2x128xf32>
    %393 = tpu.matmul %392, %341, %cst_204 {dimension_numbers = #tpu.dot_dimension_numbers<[1], [0], [0], [1], [0, 0, 1, 1], [], []>} : vector<2x32xf32>, vector<32x128xf32>, vector<2x128xf32> -> vector<2x128xf32>
    %394 = arith.addf %393, %344 : vector<2x128xf32>
    %395 = arith.index_cast %c5_i32_201 : i32 to index
    %c0_205 = arith.constant 0 : index
    %c0_206 = arith.constant 0 : index
    %396 = vector.load %arg10[%395, %c0_205, %c0_206] : memref<8x2x128xf32, #tpu.memory_space<vmem>>, vector<1x2x128xf32>
    %397 = vector.shape_cast %396 : vector<1x2x128xf32> to vector<2x128xf32>
    %398 = vector.shape_cast %394 : vector<2x128xf32> to vector<1x2x128xf32>
    tpu.vector_store %arg10[%395, %c0_205, %c0_206], %398 {strides = array<i32>} : memref<8x2x128xf32, #tpu.memory_space<vmem>>, vector<1x2x128xf32>,
    %c6_i32_207 = arith.constant 6 : i32
    %399 = arith.index_cast %c6_i32_207 : i32 to index
    %c0_208 = arith.constant 0 : index
    %c0_209 = arith.constant 0 : index
    %400 = vector.load %arg9[%399, %c0_208, %c0_209] : memref<8x2x32xf32, #tpu.memory_space<vmem>>, vector<1x2x32xf32>
    %401 = vector.shape_cast %400 : vector<1x2x32xf32> to vector<2x32xf32>
    %cst_210 = arith.constant dense<0.000000e+00> : vector<2x128xf32>
    %402 = tpu.matmul %401, %341, %cst_210 {dimension_numbers = #tpu.dot_dimension_numbers<[1], [0], [0], [1], [0, 0, 1, 1], [], []>} : vector<2x32xf32>, vector<32x128xf32>, vector<2x128xf32> -> vector<2x128xf32>
    %403 = arith.addf %402, %344 : vector<2x128xf32>
    %404 = arith.index_cast %c6_i32_207 : i32 to index
    %c0_211 = arith.constant 0 : index
    %c0_212 = arith.constant 0 : index
    %405 = vector.load %arg10[%404, %c0_211, %c0_212] : memref<8x2x128xf32, #tpu.memory_space<vmem>>, vector<1x2x128xf32>
    %406 = vector.shape_cast %405 : vector<1x2x128xf32> to vector<2x128xf32>
    %407 = vector.shape_cast %403 : vector<2x128xf32> to vector<1x2x128xf32>
    tpu.vector_store %arg10[%404, %c0_211, %c0_212], %407 {strides = array<i32>} : memref<8x2x128xf32, #tpu.memory_space<vmem>>, vector<1x2x128xf32>,
    %c7_i32_213 = arith.constant 7 : i32
    %408 = arith.index_cast %c7_i32_213 : i32 to index
    %c0_214 = arith.constant 0 : index
    %c0_215 = arith.constant 0 : index
    %409 = vector.load %arg9[%408, %c0_214, %c0_215] : memref<8x2x32xf32, #tpu.memory_space<vmem>>, vector<1x2x32xf32>
    %410 = vector.shape_cast %409 : vector<1x2x32xf32> to vector<2x32xf32>
    %cst_216 = arith.constant dense<0.000000e+00> : vector<2x128xf32>
    %411 = tpu.matmul %410, %341, %cst_216 {dimension_numbers = #tpu.dot_dimension_numbers<[1], [0], [0], [1], [0, 0, 1, 1], [], []>} : vector<2x32xf32>, vector<32x128xf32>, vector<2x128xf32> -> vector<2x128xf32>
    %412 = arith.addf %411, %344 : vector<2x128xf32>
    %413 = arith.index_cast %c7_i32_213 : i32 to index
    %c0_217 = arith.constant 0 : index
    %c0_218 = arith.constant 0 : index
    %414 = vector.load %arg10[%413, %c0_217, %c0_218] : memref<8x2x128xf32, #tpu.memory_space<vmem>>, vector<1x2x128xf32>
    %415 = vector.shape_cast %414 : vector<1x2x128xf32> to vector<2x128xf32>
    %416 = vector.shape_cast %412 : vector<2x128xf32> to vector<1x2x128xf32>
    tpu.vector_store %arg10[%413, %c0_217, %c0_218], %416 {strides = array<i32>} : memref<8x2x128xf32, #tpu.memory_space<vmem>>, vector<1x2x128xf32>,
    %c8_i32_219 = arith.constant 8 : i32
    %c0_i32_220 = arith.constant 0 : i32
    %417 = arith.cmpi eq, %arg0, %c0_i32_220 : i32
    %418 = arith.extui %417 : i1 to i32
    %c0_i32_221 = arith.constant 0 : i32
    %419 = arith.cmpi ne, %418, %c0_i32_221 : i32
    scf.if %419 {
      %c0_222 = arith.constant 0 : index
      %c0_223 = arith.constant 0 : index
      %420 = vector.load %arg11[%c0_222, %c0_223] : memref<2x32xf32, #tpu.memory_space<vmem>>, vector<2x32xf32>
      tpu.vector_store %arg11[%c0_222, %c0_223], %304 {strides = array<i32>} : memref<2x32xf32, #tpu.memory_space<vmem>>, vector<2x32xf32>,
    } else {
    }
    return
  }
  func.func @transform_0(%arg0: i32) -> (i32, i32, i32, i32) {
    %c0_i32 = arith.constant 0 : i32
    %c0_i32_0 = arith.constant 0 : i32
    %c0_i32_1 = arith.constant 0 : i32
    %c0_i32_2 = arith.constant 0 : i32
    return %c0_i32, %arg0, %c0_i32_0, %c0_i32_1 : i32, i32, i32, i32
  }
  func.func @transform_1(%arg0: i32) -> (i32, i32) {
    %c0_i32 = arith.constant 0 : i32
    %c0_i32_0 = arith.constant 0 : i32
    %c0_i32_1 = arith.constant 0 : i32
    return %c0_i32, %c0_i32_0 : i32, i32
  }
  func.func @transform_2(%arg0: i32) -> (i32, i32, i32) {
    %c0_i32 = arith.constant 0 : i32
    %c0_i32_0 = arith.constant 0 : i32
    %c0_i32_1 = arith.constant 0 : i32
    %c0_i32_2 = arith.constant 0 : i32
    return %c0_i32, %c0_i32_0, %c0_i32_1 : i32, i32, i32
  }
  func.func @transform_3(%arg0: i32) -> (i32, i32) {
    %c0_i32 = arith.constant 0 : i32
    %c0_i32_0 = arith.constant 0 : i32
    %c0_i32_1 = arith.constant 0 : i32
    return %c0_i32, %c0_i32_0 : i32, i32
  }
  func.func @transform_4(%arg0: i32) -> (i32, i32) {
    %c0_i32 = arith.constant 0 : i32
    %c0_i32_0 = arith.constant 0 : i32
    %c0_i32_1 = arith.constant 0 : i32
    return %c0_i32, %c0_i32_0 : i32, i32
  }
  func.func @transform_5(%arg0: i32) -> (i32, i32) {
    %c0_i32 = arith.constant 0 : i32
    %c0_i32_0 = arith.constant 0 : i32
    %c0_i32_1 = arith.constant 0 : i32
    return %c0_i32, %c0_i32_0 : i32, i32
  }
  func.func @transform_6(%arg0: i32) -> (i32, i32) {
    %c0_i32 = arith.constant 0 : i32
    %c0_i32_0 = arith.constant 0 : i32
    %c0_i32_1 = arith.constant 0 : i32
    return %c0_i32, %c0_i32_0 : i32, i32
  }
  func.func @transform_7(%arg0: i32) -> (i32, i32) {
    %c0_i32 = arith.constant 0 : i32
    %c0_i32_0 = arith.constant 0 : i32
    %c0_i32_1 = arith.constant 0 : i32
    return %c0_i32, %c0_i32_0 : i32, i32
  }
  func.func @transform_8(%arg0: i32) -> (i32, i32, i32) {
    %c0_i32 = arith.constant 0 : i32
    %c0_i32_0 = arith.constant 0 : i32
    %c0_i32_1 = arith.constant 0 : i32
    return %arg0, %c0_i32, %c0_i32_0 : i32, i32, i32
  }
  func.func @transform_9(%arg0: i32) -> (i32, i32, i32) {
    %c0_i32 = arith.constant 0 : i32
    %c0_i32_0 = arith.constant 0 : i32
    %c0_i32_1 = arith.constant 0 : i32
    return %arg0, %c0_i32, %c0_i32_0 : i32, i32, i32
  }
  func.func @transform_10(%arg0: i32) -> (i32, i32) {
    %c0_i32 = arith.constant 0 : i32
    %c0_i32_0 = arith.constant 0 : i32
    %c0_i32_1 = arith.constant 0 : i32
    return %c0_i32, %c0_i32_0 : i32, i32
  }
}

</mosaic_0001>

<bundles_post_ra>
// kernel: base_predictor_forward.1
= control target key start
LH: loop header
LB: loop body
LE: loop exit
PB: predicated region body
PF: predicated region fallthrough
CT: control target
= control target key end

     0   :  { %v3751_v3 = vmov 0.0|0.0   ;;  %vm3752_vm0 = vmmov 0   ;;  %v3753_v6 = vmov 0.0   ;;  %vm38_vm1 = vcmask 254976   ;;  %s4460_s0 = inlined_call_operand.vmem [shape: f32[4,8,2,32], index: 0, kind: input, shape index: {}]   ;;  %s4461_s1 = inlined_call_operand.vmem [shape: f32[2,32], index: 1, kind: input, shape index: {}]   ;;  %s4462_s2 = inlined_call_operand.vmem [shape: f32[3,32,32], index: 2, kind: input, shape index: {}]   ;;  %s4463_s3 = inlined_call_operand.vmem [shape: f32[1,32], index: 3, kind: input, shape index: {}]   ;;  %s4464_s4 = inlined_call_operand.vmem [shape: f32[1,32], index: 4, kind: input, shape index: {}]   ;;  %s4465_s5 = inlined_call_operand.vmem [shape: f32[1,32], index: 5, kind: input, shape index: {}]   ;;  %s4466_s6 = inlined_call_operand.vmem [shape: f32[32,128], index: 6, kind: input, shape index: {}]   ;;  %s4467_s7 = inlined_call_operand.vmem [shape: f32[1,128], index: 7, kind: input, shape index: {}]   ;;  %s4468_s8 = inlined_call_operand.vmem [shape: f32[8,2,32], index: 8, kind: output, shape index: {0}]   ;;  %s4469_s9 = inlined_call_operand.vmem [shape: f32[8,2,128], index: 9, kind: output, shape index: {1}]   ;;  %s4470_s10 = inlined_call_operand.hbm [shape: f32[2,32], index: 10, kind: output, shape index: {2}]  }
   0x1   :  { %v40_v0 = vld [vmem:[%s4462_s2] sm:$0xff]  ;;  %v41_v1 = vld [vmem:[%s4462_s2 + $0x8] sm:$0xff]  ;;  %v42_v2 = vld [vmem:[%s4462_s2 + $0x10] sm:$0xff]  ;;  %3435 = vmatprep.subr.bf16.mxu0 %v3751_v3  ;;  %3091 = vmatprep.mubr.msk.f32.mxu0 %vm3752_vm0, %v3753_v6 }
   0x2   :  { %v3820_v4 = vpack.c.bf16 %v41_v1, %v40_v0  ;;  %v43_v5 = vld [vmem:[%s4462_s2 + $0x18] sm:$0xff]  ;;  %v37_v7 = vld [vmem:[%s4461_s1] sm:$0x3]  ;;  %3441 = vmatprep.subr.bf16.mxu1 %v3751_v3  ;;  %v2812_v9 = vld [vmem:[%s4462_s2 + $0x28] sm:$0xff]  ;;  %3102 = vmatprep.mubr.msk.f32.mxu1 %vm3752_vm0, %v3753_v6 }
   0x3   :  { %v2811_v8 = vld [vmem:[%s4462_s2 + $0x20] sm:$0xff]  ;;  %39 = vst.msk [vmem:[#allocation2] sm:$0x3] %vm38_vm1, %v37_v7  ;;  %v2813_v10 = vld [vmem:[%s4462_s2 + $0x30] sm:$0xff]  ;;  %v2814_v11 = vld [vmem:[%s4462_s2 + $0x38] sm:$0xff]  ;;  %v3847_v12 = vpack.c.bf16 %v43_v5, %v42_v2 }
   0x4   :  { %3437 = vmatpush3.bf16.msra.mxu0 %v3820_v4  ;;  %v3849_v13 = vpack.c.bf16 %v2812_v9, %v2811_v8  ;;  %v2815_v14 = vld [vmem:[%s4462_s2 + $0x40] sm:$0xff]  ;;  %v2816_v15 = vld [vmem:[%s4462_s2 + $0x48] sm:$0xff] }
   0x5   :  { %3438 = vmatprep.subr.bf16.mxu0 %v3751_v3 }
   0x6   :  { %16 = vsyncpa [#allocation4], 0  ;;  %3443 = vmatpush3.bf16.msra.mxu1 %v3849_v13  ;;  %v3859_v16 = vpack.c.bf16 %v2814_v11, %v2813_v10  ;;  %vm62_vm2 = vcmask 261120   ;;  %v3863_v17 = vpack.c.bf16 %v2816_v15, %v2815_v14  ;;  %v2817_v18 = vld [vmem:[%s4462_s2 + $0x50] sm:$0xff]  ;;  %v2818_v19 = vld [vmem:[%s4462_s2 + $0x58] sm:$0xff]  ;;  %s3754_s24 = smov [#allocation3]  }
   0x7   :  { %3444 = vmatprep.subr.bf16.mxu1 %v3751_v3  ;;  %v3876_v21 = vpack.c.bf16 %v2818_v19, %v2817_v18  ;;  %v276_v22 = vld [vmem:[%s4460_s0] sm:$0x3]  ;;  %v2824_v24 = vld [vmem:[%s4460_s0 + $0x10] sm:$0x3]  ;;  %v2830_v54 = vld [vmem:[%s4460_s0 + $0x2] sm:$0x3] }
   0x8   :  { %3440 = vmatpush3.bf16.msra.mxu0 %v3847_v12  ;;  %v3906_v37 = vld [vmem:[%s4463_s3] ss:$0 sm:$0xff]  ;;  %v2890_v50 = vld [vmem:[%s4460_s0 + $0x30] sm:$0x3]  ;;  %v2832_v58 = vld [vmem:[%s4460_s0 + $0x12] sm:$0x3] }
   0x9   :  { %3447 = vmatprep.subr.bf16.mxu0 %v3751_v3  ;;  %v2826_v41 = vld [vmem:[%s4460_s0 + $0x20] sm:$0x3]  ;;  %v2834_v11 = vld [vmem:[%s4460_s0 + $0x22] sm:$0x3]  ;;  %s2799_s3 = sshll.u32 %s3754_s24, 4  ;;  %s2800_s3 = int_to_ptr.vmem [resolvable:$true] %s2799_s3 }
   0xa   :  { %v61_v20 = vld [vmem:[#allocation2] sm:$0x3]  ;;  %3446 = vmatpush3.bf16.msra.mxu1 %v3859_v16  ;;  %s3727_s25 = scalar_lea.vmem %s2800_s3, 32  ;;  %p3732_p1 = scmp.lt.s32.totalorder %s2800_s3, %s2800_s3 }
   0xb   :  { %3092 = vmatmul.mubr.msk.f32.vlgmr.msra.gmra.mrb[0].mxu0 %vm62_vm2, %v61_v20  ;;  %3453 = vmatprep.subr.bf16.mxu1 %v3751_v3  ;;  %p3728_p0 = scmp.ne.s32.totalorder %s2800_s3, %s3727_s25  ;;  %p3733_p2 = scmp.lt.s32.totalorder %s3727_s25, %s3727_s25 }
   0xc   :  { %3449 = vmatpush3.bf16.msra.mxu0 %v3863_v17  ;;  %3113 = vmatprep.mubr.msk.f32.mxu0 %vm3752_vm0, %v3753_v6 }
   0xd   :  { %3103 = vmatmul.mubr.msk.f32.vlgmr.msra.gmra.mrb[0].mxu1 %vm62_vm2, %v61_v20  ;;  %3450 = vmatprep.subr.bf16.mxu0 %v3751_v3  ;;  %p3734_p3 = por %p3733_p2, %p3732_p1 }
   0xe   :  { %3455 = vmatpush3.bf16.msra.mxu1 %v3820_v4  ;;  %3124 = vmatprep.mubr.msk.f32.mxu1 %vm3752_vm0, %v3753_v6 }
   0xf   :  { %3456 = vmatprep.subr.bf16.mxu1 %v3751_v3  ;;  %p3735_p4 = pnand %p3734_p3, %p3728_p0 }
  0x10   :  { %3452 = vmatpush3.bf16.msra.mxu0 %v3876_v21 }
  0x11   :  { %3459 = vmatprep.subr.bf16.mxu0 %v3751_v3 }
  0x12   :  { %3458 = vmatpush3.bf16.msra.mxu1 %v3847_v12 }
  0x13   :  { %3114 = vmatmul.mubr.msk.f32.vlgmr.msra.gmra.mrb[2].mxu0 %vm62_vm2, %v61_v20  ;;  %3465 = vmatprep.subr.bf16.mxu1 %v3751_v3 }
  0x14   :  { %3461 = vmatpush3.bf16.msra.mxu0 %v3849_v13  ;;  %3135 = vmatprep.mubr.msk.f32.mxu0 %vm3752_vm0, %v3753_v6 }
  0x15   :  { %3462 = vmatprep.subr.bf16.mxu0 %v3751_v3 }
  0x18   :  { %3464 = vmatpush3.bf16.msra.mxu0 %v3859_v16 }
  0x19   :  { %3471 = vmatprep.subr.bf16.mxu0 %v3751_v3 }
  0xde   :  { %v132_v23 = vpop.f32.mrb[0].mxu0 }
  0xdf   :  { %v277_v25 = vadd.f32 %v276_v22, %v132_v23  ;;  %v3093_v26 = vpop.f32.mrb[1].mxu0 }
  0xe0   :  { %v202_v27 = vpop.f32.mrb[0].mxu1 }
  0xe1   :  { %v2823_v28 = vmul.f32 -1.442695, %v277_v25  ;;  %v286_v29 = vadd.f32 %v2824_v24, %v202_v27  ;;  %v3104_v30 = vpop.f32.mrb[1].mxu1  ;;  %v2891_v25 = vld [vmem:[%s4460_s0 + $0x32] sm:$0x3] }
  0xe3   :  { %3631 = vpow2.f32 %v2823_v28  ;;  %v2825_v31 = vmul.f32 -1.442695, %v286_v29  ;;  %v2839_v29 = vld [vmem:[%s4460_s0 + $0x4] sm:$0x3] }
  0xe5   :  { %3633 = vpow2.f32 %v2825_v31 }
  0xe6   :  { %v272_v32 = vpop.f32.mrb[2].mxu0 }
  0xe7   :  { %v3115_v33 = vpop.f32.mrb[3].mxu0  ;;  %v273_v39 = vadd.f32 %v3906_v37, %v272_v32 }
  0xe8   :  { %v2841_v33 = vld [vmem:[%s4460_s0 + $0x14] sm:$0x3] }
  0xed   :  { %v3632_v34 = vpop.eup %3631 }
  0xee   :  { %v281_v35 = vadd.f32 1.0, %v3632_v34 }
  0xef   :  { %v3634_v36 = vpop.eup %3633 }
  0xf0   :  { %3635 = vrcp.f32 %v281_v35  ;;  %v290_v38 = vadd.f32 1.0, %v3634_v36 }
  0xf2   :  { %3637 = vrcp.f32 %v290_v38 }
  0xfa   :  { %v3636_v40 = vpop.eup %3635 }
  0xfb   :  { %v295_v42 = vmul.f32 %v3636_v40, %v273_v39 }
  0xfc   :  { %v3638_v44 = vpop.eup %3637 }
  0xfd   :  { %v296_v43 = vadd.f32 %v2826_v41, %v295_v42  ;;  %v298_v45 = vsub.f32 1.0, %v3638_v44  ;;  %v300_v48 = vmul.f32 %v3638_v44, %v61_v20 }
  0xff   :  { %3639 = vtanh.f32 %v296_v43 }
 0x109   :  { %v3640_v46 = vpop.eup %3639 }
 0x10a   :  { %v299_v47 = vmul.f32 %v3640_v46, %v298_v45 }
 0x10c   :  { %v301_v49 = vadd.f32 %v300_v48, %v299_v47  ;;  %v2843_v48 = vld [vmem:[%s4460_s0 + $0x24] sm:$0x3] }
 0x10e   :  { %303 = vst.msk [vmem:[%s4468_s8] sm:$0x3] %vm38_vm1, %v301_v49  ;;  %3125 = vmatmul.mubr.msk.f32.vlgmr.msra.gmra.mrb[2].mxu1 %vm62_vm2, %v301_v49  ;;  %3136 = vmatmul.mubr.msk.f32.vlgmr.msra.gmra.mrb[4].mxu0 %vm62_vm2, %v301_v49 }
 0x10f   :  { %3467 = vmatpush3.bf16.msra.mxu1 %v3863_v17  ;;  %3146 = vmatprep.mubr.msk.f32.mxu1 %vm3752_vm0, %v3753_v6 }
 0x110   :  { %3468 = vmatprep.subr.bf16.mxu1 %v3751_v3  ;;  %3473 = vmatpush3.bf16.msra.mxu0 %v3820_v4 }
 0x111   :  { %3474 = vmatprep.subr.bf16.mxu0 %v3751_v3  ;;  %3157 = vmatprep.mubr.msk.f32.mxu0 %vm3752_vm0, %v3753_v6 }
 0x113   :  { %3470 = vmatpush3.bf16.msra.mxu1 %v3876_v21 }
 0x114   :  { %3477 = vmatprep.subr.bf16.mxu1 %v3751_v3  ;;  %3476 = vmatpush3.bf16.msra.mxu0 %v3847_v12 }
 0x115   :  { %v1999_v51 = vld [vmem:[%s4468_s8] sm:$0x3]  ;;  %3483 = vmatprep.subr.bf16.mxu0 %v3751_v3 }
 0x116   :  { %3147 = vmatmul.mubr.msk.f32.vlgmr.msra.gmra.mrb[4].mxu1 %vm62_vm2, %v301_v49  ;;  %v3937_v52 = vadd.f32 %v2890_v50, %v1999_v51 }
 0x117   :  { %3479 = vmatpush3.bf16.msra.mxu1 %v3849_v13  ;;  %3168 = vmatprep.mubr.msk.f32.mxu1 %vm3752_vm0, %v3753_v6 }
 0x118   :  { %v2024_v53 = vsel %vm38_vm1, %v3937_v52, 0.0  ;;  %3480 = vmatprep.subr.bf16.mxu1 %v3751_v3 }
 0x119   :  { %2025 = vadd.xlane.f32.xlu0 %v2024_v53 }
 0x11b   :  { %3482 = vmatpush3.bf16.msra.mxu1 %v3859_v16 }
 0x11c   :  { %3489 = vmatprep.subr.bf16.mxu1 %v3751_v3 }
 0x1e1   :  { %v373_v55 = vpop.f32.mrb[2].mxu1  ;;  %v443_v56 = vpop.f32.mrb[4].mxu0 }
 0x1e2   :  { %v519_v57 = vadd.f32 %v2830_v54, %v373_v55  ;;  %v3126_v59 = vpop.f32.mrb[3].mxu1  ;;  %v3137_v60 = vpop.f32.mrb[5].mxu0  ;;  %v528_v62 = vadd.f32 %v2832_v58, %v443_v56  ;;  %v2892_v58 = vld [vmem:[%s4460_s0 + $0x34] sm:$0x3] }
 0x1e4   :  { %v2831_v61 = vmul.f32 -1.442695, %v519_v57  ;;  %v2833_v63 = vmul.f32 -1.442695, %v528_v62  ;;  %v2848_v62 = vld [vmem:[%s4460_s0 + $0x6] sm:$0x3] }
 0x1e6   :  { %3641 = vpow2.f32 %v2831_v61 }
 0x1e7   :  { %3643 = vpow2.f32 %v2833_v63 }
 0x1e9   :  { %v513_v0 = vpop.f32.mrb[4].mxu1 }
 0x1ea   :  { %v3148_v1 = vpop.f32.mrb[5].mxu1  ;;  %v514_v9 = vadd.f32 %v3906_v37, %v513_v0 }
 0x1f0   :  { %v3642_v2 = vpop.eup %3641 }
 0x1f1   :  { %v523_v5 = vadd.f32 1.0, %v3642_v2  ;;  %v3644_v7 = vpop.eup %3643  ;;  %v2850_v2 = vld [vmem:[%s4460_s0 + $0x16] sm:$0x3] }
 0x1f2   :  { %v532_v8 = vadd.f32 1.0, %v3644_v7 }
 0x1f3   :  { %3645 = vrcp.f32 %v523_v5 }
 0x1f4   :  { %3647 = vrcp.f32 %v532_v8 }
 0x1fd   :  { %v3646_v10 = vpop.eup %3645 }
 0x1fe   :  { %v537_v14 = vmul.f32 %v3646_v10, %v514_v9  ;;  %v3648_v18 = vpop.eup %3647 }
 0x1ff   :  { %v540_v19 = vsub.f32 1.0, %v3648_v18  ;;  %v542_v23 = vmul.f32 %v3648_v18, %v301_v49 }
 0x200   :  { %v538_v15 = vadd.f32 %v2834_v11, %v537_v14 }
 0x202   :  { %3649 = vtanh.f32 %v538_v15 }
 0x20c   :  { %v3650_v20 = vpop.eup %3649 }
 0x20d   :  { %v541_v22 = vmul.f32 %v3650_v20, %v540_v19 }
 0x20f   :  { %v543_v24 = vadd.f32 %v542_v23, %v541_v22 }
 0x211   :  { %2835 = vst.msk [vmem:[%s4468_s8 + $0x2] sm:$0x3] %vm38_vm1, %v543_v24  ;;  %3158 = vmatmul.mubr.msk.f32.vlgmr.msra.gmra.mrb[6].mxu0 %vm62_vm2, %v543_v24  ;;  %3169 = vmatmul.mubr.msk.f32.vlgmr.msra.gmra.mrb[6].mxu1 %vm62_vm2, %v543_v24 }
 0x212   :  { %3485 = vmatpush3.bf16.msra.mxu0 %v3863_v17  ;;  %3179 = vmatprep.mubr.msk.f32.mxu0 %vm3752_vm0, %v3753_v6 }
 0x213   :  { %3486 = vmatprep.subr.bf16.mxu0 %v3751_v3  ;;  %3491 = vmatpush3.bf16.msra.mxu1 %v3820_v4 }
 0x214   :  { %3492 = vmatprep.subr.bf16.mxu1 %v3751_v3  ;;  %3190 = vmatprep.mubr.msk.f32.mxu1 %vm3752_vm0, %v3753_v6 }
 0x216   :  { %3488 = vmatpush3.bf16.msra.mxu0 %v3876_v21 }
 0x217   :  { %3495 = vmatprep.subr.bf16.mxu0 %v3751_v3  ;;  %3494 = vmatpush3.bf16.msra.mxu1 %v3847_v12 }
 0x218   :  { %v2000_v26 = vld [vmem:[%s4468_s8 + $0x2] sm:$0x3]  ;;  %3501 = vmatprep.subr.bf16.mxu1 %v3751_v3 }
 0x219   :  { %3180 = vmatmul.mubr.msk.f32.vlgmr.msra.gmra.mrb[8].mxu0 %vm62_vm2, %v543_v24  ;;  %v3982_v27 = vadd.f32 %v2891_v25, %v2000_v26 }
 0x21a   :  { %3497 = vmatpush3.bf16.msra.mxu0 %v3849_v13  ;;  %3201 = vmatprep.mubr.msk.f32.mxu0 %vm3752_vm0, %v3753_v6 }
 0x21b   :  { %v2027_v28 = vsel %vm38_vm1, %v3982_v27, 0.0  ;;  %3498 = vmatprep.subr.bf16.mxu0 %v3751_v3 }
 0x21c   :  { %2028 = vadd.xlane.f32.xlu0 %v2027_v28 }
 0x21e   :  { %3500 = vmatpush3.bf16.msra.mxu0 %v3859_v16 }
 0x21f   :  { %3507 = vmatprep.subr.bf16.mxu0 %v3751_v3 }
 0x2e4   :  { %v615_v30 = vpop.f32.mrb[6].mxu0  ;;  %v685_v31 = vpop.f32.mrb[6].mxu1 }
 0x2e5   :  { %v761_v32 = vadd.f32 %v2839_v29, %v615_v30  ;;  %v3159_v34 = vpop.f32.mrb[7].mxu0  ;;  %v3170_v35 = vpop.f32.mrb[7].mxu1  ;;  %v770_v38 = vadd.f32 %v2841_v33, %v685_v31 }
 0x2e6   :  { %v2893_v34 = vld [vmem:[%s4460_s0 + $0x36] sm:$0x3] }
 0x2e7   :  { %v2840_v36 = vmul.f32 -1.442695, %v761_v32  ;;  %v2842_v39 = vmul.f32 -1.442695, %v770_v38 }
 0x2e9   :  { %3651 = vpow2.f32 %v2840_v36 }
 0x2ea   :  { %3653 = vpow2.f32 %v2842_v39  ;;  %v2857_v39 = vld [vmem:[%s4460_s0 + $0x8] sm:$0x3] }
 0x2ec   :  { %v755_v40 = vpop.f32.mrb[8].mxu0 }
 0x2ed   :  { %v3181_v41 = vpop.f32.mrb[9].mxu0  ;;  %v756_v46 = vadd.f32 %v3906_v37, %v755_v40 }
 0x2f3   :  { %v3652_v42 = vpop.eup %3651 }
 0x2f4   :  { %v765_v43 = vadd.f32 1.0, %v3652_v42  ;;  %v3654_v44 = vpop.eup %3653 }
 0x2f5   :  { %v774_v45 = vadd.f32 1.0, %v3654_v44 }
 0x2f6   :  { %3655 = vrcp.f32 %v765_v43  ;;  %v2859_v43 = vld [vmem:[%s4460_s0 + $0x18] sm:$0x3] }
 0x2f7   :  { %3657 = vrcp.f32 %v774_v45 }
 0x300   :  { %v3656_v47 = vpop.eup %3655 }
 0x301   :  { %v779_v49 = vmul.f32 %v3656_v47, %v756_v46  ;;  %v3658_v51 = vpop.eup %3657 }
 0x302   :  { %v782_v53 = vsub.f32 1.0, %v3658_v51  ;;  %v784_v56 = vmul.f32 %v3658_v51, %v543_v24  ;;  %v2852_v24 = vld [vmem:[%s4460_s0 + $0x26] sm:$0x3] }
 0x303   :  { %v780_v50 = vadd.f32 %v2843_v48, %v779_v49 }
 0x305   :  { %3659 = vtanh.f32 %v780_v50 }
 0x30f   :  { %v3660_v54 = vpop.eup %3659 }
 0x310   :  { %v783_v55 = vmul.f32 %v3660_v54, %v782_v53 }
 0x312   :  { %v785_v57 = vadd.f32 %v784_v56, %v783_v55 }
 0x314   :  { %2844 = vst.msk [vmem:[%s4468_s8 + $0x4] sm:$0x3] %vm38_vm1, %v785_v57  ;;  %3191 = vmatmul.mubr.msk.f32.vlgmr.msra.gmra.mrb[8].mxu1 %vm62_vm2, %v785_v57  ;;  %3202 = vmatmul.mubr.msk.f32.vlgmr.msra.gmra.mrb[10].mxu0 %vm62_vm2, %v785_v57 }
 0x315   :  { %3503 = vmatpush3.bf16.msra.mxu1 %v3863_v17  ;;  %3212 = vmatprep.mubr.msk.f32.mxu1 %vm3752_vm0, %v3753_v6 }
 0x316   :  { %3504 = vmatprep.subr.bf16.mxu1 %v3751_v3  ;;  %3509 = vmatpush3.bf16.msra.mxu0 %v3820_v4 }
 0x317   :  { %3510 = vmatprep.subr.bf16.mxu0 %v3751_v3  ;;  %3223 = vmatprep.mubr.msk.f32.mxu0 %vm3752_vm0, %v3753_v6 }
 0x319   :  { %3506 = vmatpush3.bf16.msra.mxu1 %v3876_v21 }
 0x31a   :  { %3513 = vmatprep.subr.bf16.mxu1 %v3751_v3  ;;  %3512 = vmatpush3.bf16.msra.mxu0 %v3847_v12 }
 0x31b   :  { %v2001_v59 = vld [vmem:[%s4468_s8 + $0x4] sm:$0x3]  ;;  %3519 = vmatprep.subr.bf16.mxu0 %v3751_v3 }
 0x31c   :  { %3213 = vmatmul.mubr.msk.f32.vlgmr.msra.gmra.mrb[10].mxu1 %vm62_vm2, %v785_v57  ;;  %v4027_v60 = vadd.f32 %v2892_v58, %v2001_v59  ;;  %v2861_v58 = vld [vmem:[%s4460_s0 + $0x28] sm:$0x3] }
 0x31d   :  { %3515 = vmatpush3.bf16.msra.mxu1 %v3849_v13  ;;  %3234 = vmatprep.mubr.msk.f32.mxu1 %vm3752_vm0, %v3753_v6 }
 0x31e   :  { %v2030_v61 = vsel %vm38_vm1, %v4027_v60, 0.0  ;;  %3516 = vmatprep.subr.bf16.mxu1 %v3751_v3 }
 0x31f   :  { %2031 = vadd.xlane.f32.xlu1 %v2030_v61 }
 0x321   :  { %3518 = vmatpush3.bf16.msra.mxu1 %v3859_v16 }
 0x322   :  { %3525 = vmatprep.subr.bf16.mxu1 %v3751_v3 }
 0x3e7   :  { %v857_v63 = vpop.f32.mrb[8].mxu1  ;;  %v927_v0 = vpop.f32.mrb[10].mxu0 }
 0x3e8   :  { %v1003_v1 = vadd.f32 %v2848_v62, %v857_v63  ;;  %v3192_v5 = vpop.f32.mrb[9].mxu1  ;;  %v3203_v7 = vpop.f32.mrb[11].mxu0  ;;  %v1012_v9 = vadd.f32 %v2850_v2, %v927_v0 }
 0x3e9   :  { %v2894_v7 = vld [vmem:[%s4460_s0 + $0x38] sm:$0x3] }
 0x3ea   :  { %v2849_v8 = vmul.f32 -1.442695, %v1003_v1  ;;  %v2851_v10 = vmul.f32 -1.442695, %v1012_v9 }
 0x3ec   :  { %3661 = vpow2.f32 %v2849_v8 }
 0x3ed   :  { %3663 = vpow2.f32 %v2851_v10 }
 0x3ef   :  { %v997_v11 = vpop.f32.mrb[10].mxu1 }
 0x3f0   :  { %v3214_v14 = vpop.f32.mrb[11].mxu1  ;;  %v998_v22 = vadd.f32 %v3906_v37, %v997_v11  ;;  %v2866_v11 = vld [vmem:[%s4460_s0 + $0xa] sm:$0x3] }
 0x3f6   :  { %v3662_v15 = vpop.eup %3661 }
 0x3f7   :  { %v1007_v18 = vadd.f32 1.0, %v3662_v15  ;;  %v3664_v19 = vpop.eup %3663 }
 0x3f8   :  { %v1016_v20 = vadd.f32 1.0, %v3664_v19  ;;  %v2868_v19 = vld [vmem:[%s4460_s0 + $0x1a] sm:$0x3] }
 0x3f9   :  { %3665 = vrcp.f32 %v1007_v18 }
 0x3fa   :  { %3667 = vrcp.f32 %v1016_v20 }
 0x403   :  { %v3666_v23 = vpop.eup %3665 }
 0x404   :  { %v1021_v25 = vmul.f32 %v3666_v23, %v998_v22  ;;  %v3668_v28 = vpop.eup %3667 }
 0x405   :  { %v1024_v29 = vsub.f32 1.0, %v3668_v28  ;;  %v1026_v32 = vmul.f32 %v3668_v28, %v785_v57 }
 0x406   :  { %v1022_v26 = vadd.f32 %v2852_v24, %v1021_v25 }
 0x408   :  { %3669 = vtanh.f32 %v1022_v26 }
 0x412   :  { %v3670_v30 = vpop.eup %3669 }
 0x413   :  { %v1025_v31 = vmul.f32 %v3670_v30, %v1024_v29 }
 0x415   :  { %v1027_v33 = vadd.f32 %v1026_v32, %v1025_v31 }
 0x417   :  { %2853 = vst.msk [vmem:[%s4468_s8 + $0x6] sm:$0x3] %vm38_vm1, %v1027_v33  ;;  %3224 = vmatmul.mubr.msk.f32.vlgmr.msra.gmra.mrb[12].mxu0 %vm62_vm2, %v1027_v33  ;;  %3235 = vmatmul.mubr.msk.f32.vlgmr.msra.gmra.mrb[12].mxu1 %vm62_vm2, %v1027_v33 }
 0x418   :  { %3521 = vmatpush3.bf16.msra.mxu0 %v3863_v17  ;;  %3245 = vmatprep.mubr.msk.f32.mxu0 %vm3752_vm0, %v3753_v6 }
 0x419   :  { %3522 = vmatprep.subr.bf16.mxu0 %v3751_v3  ;;  %3527 = vmatpush3.bf16.msra.mxu1 %v3820_v4 }
 0x41a   :  { %3528 = vmatprep.subr.bf16.mxu1 %v3751_v3  ;;  %3256 = vmatprep.mubr.msk.f32.mxu1 %vm3752_vm0, %v3753_v6 }
 0x41c   :  { %3524 = vmatpush3.bf16.msra.mxu0 %v3876_v21 }
 0x41d   :  { %3531 = vmatprep.subr.bf16.mxu0 %v3751_v3  ;;  %3530 = vmatpush3.bf16.msra.mxu1 %v3847_v12 }
 0x41e   :  { %v2002_v35 = vld [vmem:[%s4468_s8 + $0x6] sm:$0x3]  ;;  %3537 = vmatprep.subr.bf16.mxu1 %v3751_v3 }
 0x41f   :  { %3246 = vmatmul.mubr.msk.f32.vlgmr.msra.gmra.mrb[14].mxu0 %vm62_vm2, %v1027_v33  ;;  %v4072_v36 = vadd.f32 %v2893_v34, %v2002_v35  ;;  %v2870_v35 = vld [vmem:[%s4460_s0 + $0x2a] sm:$0x3] }
 0x420   :  { %3533 = vmatpush3.bf16.msra.mxu0 %v3849_v13  ;;  %3267 = vmatprep.mubr.msk.f32.mxu0 %vm3752_vm0, %v3753_v6 }
 0x421   :  { %v2033_v38 = vsel %vm38_vm1, %v4072_v36, 0.0  ;;  %3534 = vmatprep.subr.bf16.mxu0 %v3751_v3 }
 0x422   :  { %2034 = vadd.xlane.f32.xlu1 %v2033_v38 }
 0x424   :  { %3536 = vmatpush3.bf16.msra.mxu0 %v3859_v16 }
 0x425   :  { %3543 = vmatprep.subr.bf16.mxu0 %v3751_v3 }
 0x4ea   :  { %v1099_v40 = vpop.f32.mrb[12].mxu0  ;;  %v1169_v41 = vpop.f32.mrb[12].mxu1 }
 0x4eb   :  { %v1245_v42 = vadd.f32 %v2857_v39, %v1099_v40  ;;  %v3225_v44 = vpop.f32.mrb[13].mxu0  ;;  %v3236_v45 = vpop.f32.mrb[13].mxu1  ;;  %v1254_v47 = vadd.f32 %v2859_v43, %v1169_v41 }
 0x4ed   :  { %v2858_v46 = vmul.f32 -1.442695, %v1245_v42  ;;  %v2860_v48 = vmul.f32 -1.442695, %v1254_v47 }
 0x4ef   :  { %3671 = vpow2.f32 %v2858_v46  ;;  %v2895_v46 = vld [vmem:[%s4460_s0 + $0x3a] sm:$0x3] }
 0x4f0   :  { %3673 = vpow2.f32 %v2860_v48 }
 0x4f2   :  { %v1239_v49 = vpop.f32.mrb[14].mxu0 }
 0x4f3   :  { %v3247_v50 = vpop.f32.mrb[15].mxu0  ;;  %v1240_v56 = vadd.f32 %v3906_v37, %v1239_v49 }
 0x4f9   :  { %v3672_v51 = vpop.eup %3671 }
 0x4fa   :  { %v1249_v53 = vadd.f32 1.0, %v3672_v51  ;;  %v3674_v54 = vpop.eup %3673  ;;  %v2877_v51 = vld [vmem:[%s4460_s0 + $0x1c] sm:$0x3] }
 0x4fb   :  { %v1258_v55 = vadd.f32 1.0, %v3674_v54 }
 0x4fc   :  { %3675 = vrcp.f32 %v1249_v53 }
 0x4fd   :  { %3677 = vrcp.f32 %v1258_v55 }
 0x506   :  { %v3676_v57 = vpop.eup %3675 }
 0x507   :  { %v1263_v59 = vmul.f32 %v3676_v57, %v1240_v56  ;;  %v3678_v62 = vpop.eup %3677 }
 0x508   :  { %v1266_v63 = vsub.f32 1.0, %v3678_v62  ;;  %v1268_v2 = vmul.f32 %v3678_v62, %v1027_v33 }
 0x509   :  { %v1264_v61 = vadd.f32 %v2861_v58, %v1263_v59 }
 0x50b   :  { %3679 = vtanh.f32 %v1264_v61 }
 0x515   :  { %v3680_v0 = vpop.eup %3679 }
 0x516   :  { %v1267_v1 = vmul.f32 %v3680_v0, %v1266_v63 }
 0x518   :  { %v1269_v5 = vadd.f32 %v1268_v2, %v1267_v1  ;;  %v2879_v2 = vld [vmem:[%s4460_s0 + $0x2c] sm:$0x3] }
 0x51a   :  { %2862 = vst.msk [vmem:[%s4468_s8 + $0x8] sm:$0x3] %vm38_vm1, %v1269_v5  ;;  %3257 = vmatmul.mubr.msk.f32.vlgmr.msra.gmra.mrb[14].mxu1 %vm62_vm2, %v1269_v5  ;;  %3268 = vmatmul.mubr.msk.f32.vlgmr.msra.gmra.mrb[16].mxu0 %vm62_vm2, %v1269_v5 }
 0x51b   :  { %3539 = vmatpush3.bf16.msra.mxu1 %v3863_v17  ;;  %3278 = vmatprep.mubr.msk.f32.mxu1 %vm3752_vm0, %v3753_v6 }
 0x51c   :  { %3540 = vmatprep.subr.bf16.mxu1 %v3751_v3  ;;  %3545 = vmatpush3.bf16.msra.mxu0 %v3820_v4 }
 0x51d   :  { %3546 = vmatprep.subr.bf16.mxu0 %v3751_v3  ;;  %3289 = vmatprep.mubr.msk.f32.mxu0 %vm3752_vm0, %v3753_v6 }
 0x51f   :  { %3542 = vmatpush3.bf16.msra.mxu1 %v3876_v21 }
 0x520   :  { %3549 = vmatprep.subr.bf16.mxu1 %v3751_v3  ;;  %3548 = vmatpush3.bf16.msra.mxu0 %v3847_v12 }
 0x521   :  { %v2003_v8 = vld [vmem:[%s4468_s8 + $0x8] sm:$0x3]  ;;  %3555 = vmatprep.subr.bf16.mxu0 %v3751_v3 }
 0x522   :  { %3279 = vmatmul.mubr.msk.f32.vlgmr.msra.gmra.mrb[16].mxu1 %vm62_vm2, %v1269_v5  ;;  %v4117_v9 = vadd.f32 %v2894_v7, %v2003_v8 }
 0x523   :  { %3551 = vmatpush3.bf16.msra.mxu1 %v3849_v13  ;;  %3300 = vmatprep.mubr.msk.f32.mxu1 %vm3752_vm0, %v3753_v6 }
 0x524   :  { %v2036_v10 = vsel %vm38_vm1, %v4117_v9, 0.0  ;;  %3552 = vmatprep.subr.bf16.mxu1 %v3751_v3 }
 0x525   :  { %2037 = vadd.xlane.f32.xlu0 %v2036_v10 }
 0x527   :  { %3554 = vmatpush3.bf16.msra.mxu1 %v3859_v16 }
 0x528   :  { %3561 = vmatprep.subr.bf16.mxu1 %v3751_v3 }
 0x5ed   :  { %v1341_v14 = vpop.f32.mrb[14].mxu1  ;;  %v1411_v15 = vpop.f32.mrb[16].mxu0 }
 0x5ee   :  { %v1487_v18 = vadd.f32 %v2866_v11, %v1341_v14  ;;  %v3258_v20 = vpop.f32.mrb[15].mxu1  ;;  %v3269_v22 = vpop.f32.mrb[17].mxu0  ;;  %v1496_v24 = vadd.f32 %v2868_v19, %v1411_v15 }
 0x5ef   :  { %v2026_v19 = vpop.xlane.xlu0 %2025 }
 0x5f0   :  { %v2867_v23 = vmul.f32 -1.442695, %v1487_v18  ;;  %v2869_v25 = vmul.f32 -1.442695, %v1496_v24  ;;  %v2049_v20 = vmul.f32 0.03125, %v2026_v19 }
 0x5f1   :  { %v2896_v24 = vld [vmem:[%s4460_s0 + $0x3c] sm:$0x3]  ;;  %v2884_v19 = vld [vmem:[%s4460_s0 + $0xe] sm:$0x3] }
 0x5f2   :  { %3681 = vpow2.f32 %v2867_v23  ;;  %v2032_v23 = vpop.xlane.xlu1 %2031 }
 0x5f3   :  { %3683 = vpow2.f32 %v2869_v25  ;;  %v4199_v22 = vpop.xlane.xlu0 %2028  ;;  %v2051_v25 = vmul.f32 0.03125, %v2032_v23 }
 0x5f5   :  { %v1481_v26 = vpop.f32.mrb[16].mxu1 }
 0x5f6   :  { %v3280_v28 = vpop.f32.mrb[17].mxu1  ;;  %v1482_v33 = vadd.f32 %v3906_v37, %v1481_v26 }
 0x5f7   :  { %v2038_v26 = vpop.xlane.xlu0 %2037 }
 0x5fc   :  { %v3682_v29 = vpop.eup %3681 }
 0x5fd   :  { %v1491_v30 = vadd.f32 1.0, %v3682_v29  ;;  %v3684_v31 = vpop.eup %3683 }
 0x5fe   :  { %v1500_v32 = vadd.f32 1.0, %v3684_v31 }
 0x5ff   :  { %3685 = vrcp.f32 %v1491_v30  ;;  %v2053_v30 = vmul.f32 0.03125, %v2038_v26 }
 0x600   :  { %3687 = vrcp.f32 %v1500_v32 }
 0x601   :  { %v2061_v32 = vsub.f32 %v4117_v9, %v2053_v30 }
 0x609   :  { %v3686_v34 = vpop.eup %3685 }
 0x60a   :  { %v1505_v38 = vmul.f32 %v3686_v34, %v1482_v33  ;;  %v3688_v40 = vpop.eup %3687 }
 0x60b   :  { %v1508_v41 = vsub.f32 1.0, %v3688_v40  ;;  %v1510_v44 = vmul.f32 %v3688_v40, %v1269_v5  ;;  %v2168_v40 = vld [vmem:[%s4466_s6 + $0x8] sm:$0xff] }
 0x60c   :  { %v1506_v39 = vadd.f32 %v2870_v35, %v1505_v38  ;;  %v2069_v38 = vmul.f32 %v2061_v32, %v2061_v32 }
 0x60e   :  { %3689 = vtanh.f32 %v1506_v39  ;;  %v2085_v39 = vsel %vm38_vm1, %v2069_v38, 0.0 }
 0x618   :  { %v3690_v42 = vpop.eup %3689 }
 0x619   :  { %v1509_v43 = vmul.f32 %v3690_v42, %v1508_v41  ;;  %v2169_v41 = vld [vmem:[%s4466_s6 + $0x10] sm:$0xff]  ;;  %v2170_v42 = vld [vmem:[%s4466_s6 + $0x18] sm:$0xff] }
 0x61b   :  { %v1511_v45 = vadd.f32 %v1510_v44, %v1509_v43  ;;  %v4238_v43 = vpack.c.bf16 %v2170_v42, %v2169_v41 }
 0x61d   :  { %2871 = vst.msk [vmem:[%s4468_s8 + $0xa] sm:$0x3] %vm38_vm1, %v1511_v45  ;;  %3290 = vmatmul.mubr.msk.f32.vlgmr.msra.gmra.mrb[18].mxu0 %vm62_vm2, %v1511_v45  ;;  %3301 = vmatmul.mubr.msk.f32.vlgmr.msra.gmra.mrb[18].mxu1 %vm62_vm2, %v1511_v45 }
 0x61e   :  { %3557 = vmatpush3.bf16.msra.mxu0 %v3863_v17  ;;  %3311 = vmatprep.mubr.msk.f32.mxu0 %vm3752_vm0, %v3753_v6 }
 0x61f   :  { %3558 = vmatprep.subr.bf16.mxu0 %v3751_v3  ;;  %3563 = vmatpush3.bf16.msra.mxu1 %v3820_v4 }
 0x620   :  { %3564 = vmatprep.subr.bf16.mxu1 %v3751_v3  ;;  %3322 = vmatprep.mubr.msk.f32.mxu1 %vm3752_vm0, %v3753_v6 }
 0x622   :  { %3560 = vmatpush3.bf16.msra.mxu0 %v3876_v21 }
 0x623   :  { %3567 = vmatprep.subr.bf16.mxu0 %v3751_v3  ;;  %3566 = vmatpush3.bf16.msra.mxu1 %v3847_v12  ;;  %v2875_v12 = vld [vmem:[%s4460_s0 + $0xc] sm:$0x3] }
 0x624   :  { %v2004_v47 = vld [vmem:[%s4468_s8 + $0xa] sm:$0x3]  ;;  %3573 = vmatprep.subr.bf16.mxu1 %v3751_v3 }
 0x625   :  { %3312 = vmatmul.mubr.msk.f32.vlgmr.msra.gmra.mrb[20].mxu0 %vm62_vm2, %v1511_v45  ;;  %v4162_v4 = vadd.f32 %v2895_v46, %v2004_v47 }
 0x626   :  { %3569 = vmatpush3.bf16.msra.mxu0 %v3849_v13  ;;  %3333 = vmatprep.mubr.msk.f32.mxu0 %vm3752_vm0, %v3753_v6 }
 0x627   :  { %v2039_v48 = vsel %vm38_vm1, %v4162_v4, 0.0  ;;  %3570 = vmatprep.subr.bf16.mxu0 %v3751_v3 }
 0x628   :  { %2040 = vadd.xlane.f32.xlu1 %v2039_v48 }
 0x62a   :  { %3572 = vmatpush3.bf16.msra.mxu0 %v3859_v16 }
 0x62b   :  { %3579 = vmatprep.subr.bf16.mxu0 %v3751_v3 }
 0x6f0   :  { %v1583_v49 = vpop.f32.mrb[18].mxu0  ;;  %v1653_v50 = vpop.f32.mrb[18].mxu1 }
 0x6f1   :  { %v1729_v13 = vadd.f32 %v2875_v12, %v1583_v49  ;;  %v3291_v53 = vpop.f32.mrb[19].mxu0  ;;  %v3302_v54 = vpop.f32.mrb[19].mxu1  ;;  %v1738_v56 = vadd.f32 %v2877_v51, %v1653_v50 }
 0x6f3   :  { %v2876_v55 = vmul.f32 -1.442695, %v1729_v13  ;;  %v2878_v57 = vmul.f32 -1.442695, %v1738_v56 }
 0x6f5   :  { %3691 = vpow2.f32 %v2876_v55 }
 0x6f6   :  { %3693 = vpow2.f32 %v2878_v57 }
 0x6f8   :  { %v1723_v16 = vpop.f32.mrb[20].mxu0 }
 0x6f9   :  { %v3313_v58 = vpop.f32.mrb[21].mxu0  ;;  %v1724_v0 = vadd.f32 %v3906_v37, %v1723_v16  ;;  %v4252_v16 = vld [vmem:[%s4464_s4] ss:$0 sm:$0xff] }
 0x6ff   :  { %v3692_v59 = vpop.eup %3691 }
 0x700   :  { %v1733_v61 = vadd.f32 1.0, %v3692_v59  ;;  %v3694_v62 = vpop.eup %3693  ;;  %v4257_v59 = vld [vmem:[%s4465_s5] ss:$0 sm:$0xff] }
 0x701   :  { %v1742_v63 = vadd.f32 1.0, %v3694_v62 }
 0x702   :  { %3695 = vrcp.f32 %v1733_v61 }
 0x703   :  { %3697 = vrcp.f32 %v1742_v63 }
 0x70c   :  { %v3696_v1 = vpop.eup %3695 }
 0x70d   :  { %v1747_v5 = vmul.f32 %v3696_v1, %v1724_v0  ;;  %v3698_v8 = vpop.eup %3697 }
 0x70e   :  { %v1750_v10 = vsub.f32 1.0, %v3698_v8  ;;  %v1752_v15 = vmul.f32 %v3698_v8, %v1511_v45 }
 0x70f   :  { %v1748_v7 = vadd.f32 %v2879_v2, %v1747_v5 }
 0x711   :  { %3699 = vtanh.f32 %v1748_v7 }
 0x71b   :  { %v3700_v11 = vpop.eup %3699 }
 0x71c   :  { %v1751_v14 = vmul.f32 %v3700_v11, %v1750_v10 }
 0x71e   :  { %v4182_v18 = vadd.f32 %v1752_v15, %v1751_v14 }
 0x720   :  { %2880 = vst.msk [vmem:[%s4468_s8 + $0xc] sm:$0x3] %vm38_vm1, %v4182_v18  ;;  %3323 = vmatmul.mubr.msk.f32.vlgmr.msra.gmra.mrb[20].mxu1 %vm62_vm2, %v4182_v18  ;;  %3334 = vmatmul.mubr.msk.f32.vlgmr.msra.gmra.mrb[22].mxu0 %vm62_vm2, %v4182_v18 }
 0x721   :  { %3575 = vmatpush3.bf16.msra.mxu1 %v3863_v17  ;;  %3344 = vmatprep.mubr.msk.f32.mxu1 %vm3752_vm0, %v3753_v6  ;;  %v2057_v17 = vsub.f32 %v3937_v52, %v2049_v20 }
 0x722   :  { %3576 = vmatprep.subr.bf16.mxu1 %v3751_v3  ;;  %3355 = vmatprep.mubr.msk.f32.mxu0 %vm3752_vm0, %v3753_v6 }
 0x723   :  { %v2065_v31 = vmul.f32 %v2057_v17, %v2057_v17 }
 0x725   :  { %3578 = vmatpush3.bf16.msra.mxu1 %v3876_v21  ;;  %v2059_v21 = vsub.f32 %v4027_v60, %v2051_v25  ;;  %v2073_v33 = vsel %vm38_vm1, %v2065_v31, 0.0  ;;  %v2167_v60 = vld [vmem:[%s4466_s6] sm:$0xff] }
 0x726   :  { %3585 = vmatprep.subr.bf16.mxu1 %v3751_v3  ;;  %v4226_v9 = vpack.c.bf16 %v2168_v40, %v2167_v60 }
 0x727   :  { %v2005_v28 = vld [vmem:[%s4468_s8 + $0xc] sm:$0x3]  ;;  %v2067_v34 = vmul.f32 %v2059_v21, %v2059_v21 }
 0x728   :  { %3345 = vmatmul.mubr.msk.f32.vlgmr.msra.gmra.mrb[22].mxu1 %vm62_vm2, %v4182_v18  ;;  %v2022_v29 = vadd.f32 %v2896_v24, %v2005_v28  ;;  %3581 = vmatpush3.bf16.msra.mxu0 %v4226_v9 }
 0x729   :  { %3366 = vmatprep.mubr.msk.f32.mxu1 %vm3752_vm0, %v3753_v6  ;;  %v2079_v35 = vsel %vm38_vm1, %v2067_v34, 0.0  ;;  %3587 = vmatpush3.bf16.msra.mxu1 %v4226_v9 }
 0x72a   :  { %v2042_v52 = vsel %vm38_vm1, %v2022_v29, 0.0  ;;  %3582 = vmatprep.subr.bf16.mxu0 %v3751_v3  ;;  %3588 = vmatprep.subr.bf16.mxu1 %v3751_v3 }
 0x72b   :  { %2043 = vadd.xlane.f32.xlu0 %v2042_v52 }
 0x72c   :  { %3584 = vmatpush3.bf16.msra.mxu0 %v4238_v43 }
 0x72d   :  { %3590 = vmatpush3.bf16.msra.mxu1 %v4238_v43  ;;  %3591 = vmatprep.subr.bf16.mxu0 %v3751_v3 }
 0x72e   :  { %3597 = vmatprep.subr.bf16.mxu1 %v3751_v3 }
 0x72f   :  { %2074 = vadd.xlane.f32.xlu0 %v2073_v33 }
 0x733   :  { %2080 = vadd.xlane.f32.xlu0 %v2079_v35 }
 0x737   :  { %2086 = vadd.xlane.f32.xlu0 %v2085_v39  ;;  %v2888_v39 = vld [vmem:[%s4460_s0 + $0x2e] sm:$0x3] }
 0x7b8   :  { %v2044_v44 = vpop.xlane.xlu0 %2043 }
 0x7b9   :  { %v2055_v45 = vmul.f32 0.03125, %v2044_v44 }
 0x7bb   :  { %v4244_v46 = vsub.f32 %v2022_v29, %v2055_v45 }
 0x7bc   :  { %v2075_v47 = vpop.xlane.xlu0 %2074 }
 0x7bd   :  { %v2097_v48 = vmul.f32 0.03125, %v2075_v47  ;;  %v2071_v12 = vmul.f32 %v4244_v46, %v4244_v46 }
 0x7bf   :  { %v2105_v49 = vadd.f32 1e-05, %v2097_v48  ;;  %v2091_v50 = vsel %vm38_vm1, %v2071_v12, 0.0  ;;  %v2035_v12 = vpop.xlane.xlu1 %2034 }
 0x7c0   :  { %2092 = vadd.xlane.f32.xlu0 %v2091_v50  ;;  %v2081_v13 = vpop.xlane.xlu0 %2080  ;;  %v2052_v50 = vmul.f32 0.03125, %v2035_v12 }
 0x7c1   :  { %3701 = vrsqrt.f32 %v2105_v49  ;;  %v2099_v51 = vmul.f32 0.03125, %v2081_v13  ;;  %v2897_v49 = vld [vmem:[%s4460_s0 + $0x3e] sm:$0x3] }
 0x7c3   :  { %v2107_v53 = vadd.f32 1e-05, %v2099_v51  ;;  %v2041_v13 = vpop.xlane.xlu1 %2040 }
 0x7c4   :  { %v2087_v54 = vpop.xlane.xlu0 %2086 }
 0x7c5   :  { %3703 = vrsqrt.f32 %v2107_v53  ;;  %v2101_v55 = vmul.f32 0.03125, %v2087_v54  ;;  %v2060_v54 = vsub.f32 %v4072_v36, %v2052_v50 }
 0x7c7   :  { %v2109_v56 = vadd.f32 1e-05, %v2101_v55  ;;  %v2054_v55 = vmul.f32 0.03125, %v2041_v13 }
 0x7c9   :  { %3705 = vrsqrt.f32 %v2109_v56 }
 0x7cb   :  { %v3702_v57 = vpop.eup %3701 }
 0x7cc   :  { %v2121_v58 = vmul.f32 %v3702_v57, %v2057_v17  ;;  %v2886_v17 = vld [vmem:[%s4460_s0 + $0x1e] sm:$0x3]  ;;  %v2062_v57 = vsub.f32 %v4162_v4, %v2054_v55 }
 0x7ce   :  { %v2136_v61 = vmul.f32 %v4252_v16, %v2121_v58 }
 0x7cf   :  { %v3704_v62 = vpop.eup %3703 }
 0x7d0   :  { %v2151_v63 = vadd.f32 %v4257_v59, %v2136_v61  ;;  %v2123_v0 = vmul.f32 %v3704_v62, %v2059_v21  ;;  %v2068_v61 = vmul.f32 %v2060_v54, %v2060_v54  ;;  %v2070_v62 = vmul.f32 %v2062_v57, %v2062_v57 }
 0x7d2   :  { %2159 = vst.msk [vmem:[%s4468_s8] sm:$0x3] %vm38_vm1, %v2151_v63  ;;  %v2138_v1 = vmul.f32 %v4252_v16, %v2123_v0  ;;  %v2088_v63 = vsel %vm38_vm1, %v2070_v62, 0.0 }
 0x7d3   :  { %v3706_v2 = vpop.eup %3705 }
 0x7d4   :  { %v2153_v5 = vadd.f32 %v4257_v59, %v2138_v1  ;;  %v2125_v7 = vmul.f32 %v3706_v2, %v2061_v32 }
 0x7d6   :  { %2161 = vst.msk [vmem:[%s4468_s8 + $0x4] sm:$0x3] %vm38_vm1, %v2153_v5  ;;  %v2140_v8 = vmul.f32 %v4252_v16, %v2125_v7 }
 0x7d8   :  { %v2155_v10 = vadd.f32 %v4257_v59, %v2140_v8 }
 0x7d9   :  { %v2178_v11 = vld [vmem:[%s4468_s8] sm:$0x3] }
 0x7da   :  { %2163 = vst.msk [vmem:[%s4468_s8 + $0x8] sm:$0x3] %vm38_vm1, %v2155_v10  ;;  %3356 = vmatmul.mubr.msk.f32.vlgmr.msra.gmra.mrb[24].mxu0 %vm62_vm2, %v2178_v11  ;;  %v4351_v10 = vld [vmem:[%s4467_s7] ss:$0 sm:$0xff] }
 0x7db   :  { %3593 = vmatpush3.bf16.msra.mxu0 %v4226_v9  ;;  %3377 = vmatprep.mubr.msk.f32.mxu0 %vm3752_vm0, %v3753_v6 }
 0x7dc   :  { %3594 = vmatprep.subr.bf16.mxu0 %v3751_v3 }
 0x7dd   :  { %v2905_v14 = vld [vmem:[%s4468_s8 + $0x4] sm:$0x3] }
 0x7df   :  { %3596 = vmatpush3.bf16.msra.mxu0 %v4238_v43 }
 0x7e0   :  { %3603 = vmatprep.subr.bf16.mxu0 %v3751_v3 }
 0x7e1   :  { %v2911_v15 = vld [vmem:[%s4468_s8 + $0x8] sm:$0x3] }
 0x7e2   :  { %3378 = vmatmul.mubr.msk.f32.vlgmr.msra.gmra.mrb[26].mxu0 %vm62_vm2, %v2905_v14 }
 0x7e3   :  { %3605 = vmatpush3.bf16.msra.mxu0 %v4226_v9  ;;  %3399 = vmatprep.mubr.msk.f32.mxu0 %vm3752_vm0, %v3753_v6 }
 0x7e4   :  { %3606 = vmatprep.subr.bf16.mxu0 %v3751_v3 }
 0x7e7   :  { %3608 = vmatpush3.bf16.msra.mxu0 %v4238_v43 }
 0x7e8   :  { %3615 = vmatprep.subr.bf16.mxu0 %v3751_v3 }
 0x7ea   :  { %3400 = vmatmul.mubr.msk.f32.vlgmr.msra.gmra.mrb[28].mxu0 %vm62_vm2, %v2911_v15 }
 0x7eb   :  { %3617 = vmatpush3.bf16.msra.mxu0 %v4226_v9  ;;  %3421 = vmatprep.mubr.msk.f32.mxu0 %vm3752_vm0, %v3753_v6 }
 0x7ec   :  { %3618 = vmatprep.subr.bf16.mxu0 %v3751_v3 }
 0x7ef   :  { %3620 = vmatpush3.bf16.msra.mxu0 %v4238_v43 }
 0x7f3   :  { %v1825_v20 = vpop.f32.mrb[20].mxu1  ;;  %v1895_v23 = vpop.f32.mrb[22].mxu0 }
 0x7f4   :  { %v1971_v24 = vadd.f32 %v2884_v19, %v1825_v20  ;;  %v3324_v25 = vpop.f32.mrb[21].mxu1  ;;  %v3335_v26 = vpop.f32.mrb[23].mxu0  ;;  %v1980_v29 = vadd.f32 %v2886_v17, %v1895_v23 }
 0x7f6   :  { %v2885_v28 = vmul.f32 -1.442695, %v1971_v24  ;;  %v2887_v21 = vmul.f32 -1.442695, %v1980_v29 }
 0x7f8   :  { %3707 = vpow2.f32 %v2885_v28 }
 0x7f9   :  { %3709 = vpow2.f32 %v2887_v21 }
 0x7fb   :  { %v1965_v30 = vpop.f32.mrb[22].mxu1 }
 0x7fc   :  { %v3346_v52 = vpop.f32.mrb[23].mxu1  ;;  %v1966_v35 = vadd.f32 %v3906_v37, %v1965_v30  ;;  %v2050_v37 = vmul.f32 0.03125, %v4199_v22 }
 0x802   :  { %v3708_v31 = vpop.eup %3707 }
 0x803   :  { %v1975_v32 = vadd.f32 1.0, %v3708_v31  ;;  %v3710_v33 = vpop.eup %3709 }
 0x804   :  { %v1984_v34 = vadd.f32 1.0, %v3710_v33 }
 0x805   :  { %3711 = vrcp.f32 %v1975_v32 }
 0x806   :  { %3713 = vrcp.f32 %v1984_v34 }
 0x80f   :  { %v3712_v38 = vpop.eup %3711 }
 0x810   :  { %v1989_v60 = vmul.f32 %v3712_v38, %v1966_v35  ;;  %v3714_v41 = vpop.eup %3713 }
 0x811   :  { %v1992_v42 = vsub.f32 1.0, %v3714_v41  ;;  %v1994_v45 = vmul.f32 %v3714_v41, %v4182_v18  ;;  %v2058_v18 = vsub.f32 %v3982_v27, %v2050_v37  ;;  %v2082_v27 = vsel %vm38_vm1, %v2068_v61, 0.0 }
 0x812   :  { %v1990_v40 = vadd.f32 %v2888_v39, %v1989_v60 }
 0x813   :  { %v2066_v22 = vmul.f32 %v2058_v18, %v2058_v18 }
 0x814   :  { %3715 = vtanh.f32 %v1990_v40 }
 0x815   :  { %v2076_v58 = vsel %vm38_vm1, %v2066_v22, 0.0 }
 0x81e   :  { %v3716_v44 = vpop.eup %3715 }
 0x81f   :  { %v1993_v47 = vmul.f32 %v3716_v44, %v1992_v42 }
 0x821   :  { %v1995_v48 = vadd.f32 %v1994_v45, %v1993_v47 }
 0x823   :  { %2889 = vst.msk [vmem:[%s4468_s8 + $0xe] sm:$0x3] %vm38_vm1, %v1995_v48  ;;  %1998 = vst.msk [vmem:[#allocation2] sm:$0x3] %vm38_vm1, %v1995_v48 }
 0x824   :  { %2788 = vst.msk [vmem:[#allocation3] sm:$0x3] %vm38_vm1, %v1995_v48 }
 0x82a   :  { %v2006_v51 = vld [vmem:[%s4468_s8 + $0xe] sm:$0x3] }
 0x82b   :  { %v2023_v53 = vadd.f32 %v2897_v49, %v2006_v51 }
 0x82d   :  { %v2045_v56 = vsel %vm38_vm1, %v2023_v53, 0.0 }
 0x82e   :  { %2046 = vadd.xlane.f32.xlu1 %v2045_v56 }
 0x832   :  { %2077 = vadd.xlane.f32.xlu1 %v2076_v58 }
 0x836   :  { %2083 = vadd.xlane.f32.xlu1 %v2082_v27 }
 0x83a   :  { %2089 = vadd.xlane.f32.xlu1 %v2088_v63 }
 0x84d   :  { %v2093_v0 = vpop.xlane.xlu0 %2092 }
 0x84e   :  { %v2103_v36 = vmul.f32 0.03125, %v2093_v0 }
 0x850   :  { %v2111_v1 = vadd.f32 1e-05, %v2103_v36 }
 0x852   :  { %3717 = vrsqrt.f32 %v2111_v1 }
 0x85c   :  { %v3718_v2 = vpop.eup %3717 }
 0x85d   :  { %v2127_v5 = vmul.f32 %v3718_v2, %v4244_v46 }
 0x85f   :  { %v2142_v4 = vmul.f32 %v4252_v16, %v2127_v5 }
 0x861   :  { %v2157_v7 = vadd.f32 %v4257_v59, %v2142_v4 }
 0x863   :  { %2165 = vst.msk [vmem:[%s4468_s8 + $0xc] sm:$0x3] %vm38_vm1, %v2157_v7 }
 0x86a   :  { %v2917_v8 = vld [vmem:[%s4468_s8 + $0xc] sm:$0x3] }
 0x86b   :  { %3422 = vmatmul.mubr.msk.f32.vlgmr.msra.gmra.mrb[30].mxu0 %vm62_vm2, %v2917_v8 }
 0x8ad   :  { %v2248_v46 = vpop.f32.mrb[24].mxu0 }
 0x8ae   :  { %v2249_v11 = vadd.f32 %v4351_v10, %v2248_v46  ;;  %v3357_v14 = vpop.f32.mrb[25].mxu0 }
 0x8b0   :  { %2252 = vst [vmem:[%s4469_s9] sm:$0x3] %v2249_v11 }
 0x8b5   :  { %v2399_v15 = vpop.f32.mrb[26].mxu0 }
 0x8b6   :  { %v2400_v19 = vadd.f32 %v4351_v10, %v2399_v15  ;;  %v3379_v20 = vpop.f32.mrb[27].mxu0 }
 0x8b8   :  { %2907 = vst [vmem:[%s4469_s9 + $0x4] sm:$0x3] %v2400_v19 }
 0x8bb   :  { %v2047_v23 = vpop.xlane.xlu1 %2046 }
 0x8bc   :  { %v2056_v24 = vmul.f32 0.03125, %v2047_v23 }
 0x8bd   :  { %v2551_v17 = vpop.f32.mrb[28].mxu0 }
 0x8be   :  { %v4361_v25 = vsub.f32 %v2023_v53, %v2056_v24  ;;  %v2552_v26 = vadd.f32 %v4351_v10, %v2551_v17  ;;  %v3401_v28 = vpop.f32.mrb[29].mxu0 }
 0x8bf   :  { %v2078_v29 = vpop.xlane.xlu1 %2077 }
 0x8c0   :  { %2913 = vst [vmem:[%s4469_s9 + $0x8] sm:$0x3] %v2552_v26  ;;  %v2098_v21 = vmul.f32 0.03125, %v2078_v29  ;;  %v2072_v30 = vmul.f32 %v4361_v25, %v4361_v25 }
 0x8c2   :  { %v2106_v52 = vadd.f32 1e-05, %v2098_v21  ;;  %v2094_v31 = vsel %vm38_vm1, %v2072_v30, 0.0 }
 0x8c3   :  { %2095 = vadd.xlane.f32.xlu1 %v2094_v31  ;;  %v2084_v32 = vpop.xlane.xlu1 %2083 }
 0x8c4   :  { %3719 = vrsqrt.f32 %v2106_v52  ;;  %v2100_v33 = vmul.f32 0.03125, %v2084_v32 }
 0x8c6   :  { %v2108_v34 = vadd.f32 1e-05, %v2100_v33 }
 0x8c7   :  { %v2090_v35 = vpop.xlane.xlu1 %2089 }
 0x8c8   :  { %3721 = vrsqrt.f32 %v2108_v34  ;;  %v2102_v38 = vmul.f32 0.03125, %v2090_v35 }
 0x8ca   :  { %v2110_v39 = vadd.f32 1e-05, %v2102_v38 }
 0x8cc   :  { %3723 = vrsqrt.f32 %v2110_v39 }
 0x8ce   :  { %v3720_v60 = vpop.eup %3719 }
 0x8cf   :  { %v2122_v40 = vmul.f32 %v3720_v60, %v2058_v18 }
 0x8d1   :  { %v2137_v41 = vmul.f32 %v4252_v16, %v2122_v40 }
 0x8d2   :  { %v3722_v42 = vpop.eup %3721 }
 0x8d3   :  { %v2152_v44 = vadd.f32 %v4257_v59, %v2137_v41  ;;  %v2124_v45 = vmul.f32 %v3722_v42, %v2060_v54 }
 0x8d5   :  { %2160 = vst.msk [vmem:[%s4468_s8 + $0x2] sm:$0x3] %vm38_vm1, %v2152_v44  ;;  %v2139_v47 = vmul.f32 %v4252_v16, %v2124_v45 }
 0x8d6   :  { %v3724_v48 = vpop.eup %3723 }
 0x8d7   :  { %v2154_v37 = vadd.f32 %v4257_v59, %v2139_v47  ;;  %v2126_v12 = vmul.f32 %v3724_v48, %v2062_v57 }
 0x8d9   :  { %2162 = vst.msk [vmem:[%s4468_s8 + $0x6] sm:$0x3] %vm38_vm1, %v2154_v37  ;;  %v2141_v49 = vmul.f32 %v4252_v16, %v2126_v12 }
 0x8db   :  { %v2156_v18 = vadd.f32 %v4257_v59, %v2141_v49 }
 0x8dc   :  { %v2902_v50 = vld [vmem:[%s4468_s8 + $0x2] sm:$0x3] }
 0x8dd   :  { %2164 = vst.msk [vmem:[%s4468_s8 + $0xa] sm:$0x3] %vm38_vm1, %v2156_v18  ;;  %3367 = vmatmul.mubr.msk.f32.vlgmr.msra.gmra.mrb[24].mxu1 %vm62_vm2, %v2902_v50 }
 0x8de   :  { %3599 = vmatpush3.bf16.msra.mxu1 %v4226_v9  ;;  %3388 = vmatprep.mubr.msk.f32.mxu1 %vm3752_vm0, %v3753_v6 }
 0x8df   :  { %3600 = vmatprep.subr.bf16.mxu1 %v3751_v3 }
 0x8e0   :  { %v2908_v13 = vld [vmem:[%s4468_s8 + $0x6] sm:$0x3] }
 0x8e2   :  { %3602 = vmatpush3.bf16.msra.mxu1 %v4238_v43 }
 0x8e3   :  { %3609 = vmatprep.subr.bf16.mxu1 %v3751_v3 }
 0x8e4   :  { %v2914_v51 = vld [vmem:[%s4468_s8 + $0xa] sm:$0x3] }
 0x8e5   :  { %3389 = vmatmul.mubr.msk.f32.vlgmr.msra.gmra.mrb[26].mxu1 %vm62_vm2, %v2908_v13 }
 0x8e6   :  { %3611 = vmatpush3.bf16.msra.mxu1 %v4226_v9  ;;  %3410 = vmatprep.mubr.msk.f32.mxu1 %vm3752_vm0, %v3753_v6 }
 0x8e7   :  { %3612 = vmatprep.subr.bf16.mxu1 %v3751_v3 }
 0x8ea   :  { %3614 = vmatpush3.bf16.msra.mxu1 %v4238_v43 }
 0x8eb   :  { %3621 = vmatprep.subr.bf16.mxu1 %v3751_v3 }
 0x8ed   :  { %3411 = vmatmul.mubr.msk.f32.vlgmr.msra.gmra.mrb[28].mxu1 %vm62_vm2, %v2914_v51 }
 0x8ee   :  { %3623 = vmatpush3.bf16.msra.mxu1 %v4226_v9  ;;  %3432 = vmatprep.mubr.msk.f32.mxu1 %vm3752_vm0, %v3753_v6 }
 0x8ef   :  { %3624 = vmatprep.subr.bf16.mxu1 %v3751_v3 }
 0x8f2   :  { %3626 = vmatpush3.bf16.msra.mxu1 %v4238_v43 }
 0x93e   :  { %v2703_v53 = vpop.f32.mrb[30].mxu0 }
 0x93f   :  { %v2704_v54 = vadd.f32 %v4351_v10, %v2703_v53  ;;  %v3423_v55 = vpop.f32.mrb[31].mxu0 }
 0x941   :  { %2919 = vst [vmem:[%s4469_s9 + $0xc] sm:$0x3] %v2704_v54 }
 0x950   :  { %v2096_v56 = vpop.xlane.xlu1 %2095 }
 0x951   :  { %v2104_v22 = vmul.f32 0.03125, %v2096_v56 }
 0x953   :  { %v2112_v57 = vadd.f32 1e-05, %v2104_v22 }
 0x955   :  { %3725 = vrsqrt.f32 %v2112_v57 }
 0x95f   :  { %v3726_v9 = vpop.eup %3725 }
 0x960   :  { %v2128_v58 = vmul.f32 %v3726_v9, %v4361_v25 }
 0x962   :  { %v2143_v6 = vmul.f32 %v4252_v16, %v2128_v58 }
 0x964   :  { %v2158_v3 = vadd.f32 %v4257_v59, %v2143_v6 }
 0x966   :  { %2166 = vst.msk [vmem:[%s4468_s8 + $0xe] sm:$0x3] %vm38_vm1, %v2158_v3 }
 0x96d   :  { %v2920_v43 = vld [vmem:[%s4468_s8 + $0xe] sm:$0x3] }
 0x96e   :  { %3433 = vmatmul.mubr.msk.f32.vlgmr.msra.gmra.mrb[30].mxu1 %vm62_vm2, %v2920_v43 }
 0x9b0   :  { %v2323_v61 = vpop.f32.mrb[24].mxu1 }
 0x9b1   :  { %v2324_v27 = vadd.f32 %v4351_v10, %v2323_v61  ;;  %v3368_v62 = vpop.f32.mrb[25].mxu1 }
 0x9b3   :  { %2904 = vst [vmem:[%s4469_s9 + $0x2] sm:$0x3] %v2324_v27 }
 0x9b8   :  { %v2475_v16 = vpop.f32.mrb[26].mxu1 }
 0x9b9   :  { %v2476_v59 = vadd.f32 %v4351_v10, %v2475_v16  ;;  %v3390_v63 = vpop.f32.mrb[27].mxu1 }
 0x9bb   :  { %2910 = vst [vmem:[%s4469_s9 + $0x6] sm:$0x3] %v2476_v59 }
 0x9c0   :  { %v2627_v0 = vpop.f32.mrb[28].mxu1 }
 0x9c1   :  { %v2628_v36 = vadd.f32 %v4351_v10, %v2627_v0  ;;  %v3412_v1 = vpop.f32.mrb[29].mxu1 }
 0x9c3   :  { %2916 = vst [vmem:[%s4469_s9 + $0xa] sm:$0x3] %v2628_v36 }
 0x9c4   :  { %3738 = shalt.err (!%p3735_p4)
}
 0x9c5   :  { %s3739_s27 = scalar_lea.hbm %s4470_s10, 32 }
 0x9c6   :  { %p3740_p5 = scmp.ne.s32.totalorder %s4470_s10, %s3739_s27  ;;  %p3743_p6 = scmp.lt.u32.totalorder %s3739_s27, %s4470_s10 }
 0x9c8   :  { %p3745_p7 = pnand %p3743_p6, %p3740_p5 }
 0x9ca   :  { %3748 = shalt.err (!%p3745_p7)
}
 0x9cb   :  { %2802 = dma.vmem_to_hbm [thread:$0]  %s2800_s3, 32, %s4470_s10, [#allocation4]  }
 0xa41   :  { %v2779_v2 = vpop.f32.mrb[30].mxu1 }
 0xa42   :  { %v2780_v5 = vadd.f32 %v4351_v10, %v2779_v2  ;;  %v3434_v4 = vpop.f32.mrb[31].mxu1 }
 0xa44   :  { %2922 = vst [vmem:[%s4469_s9 + $0xe] sm:$0x3] %v2780_v5 }
 0xa45   :  { %3749 = dma.done.wait [#allocation4], 32  }
 0xa46   :  { %3750 = vsyncadd [#allocation4], 4294967264 }
 0xa47   :  { %2810 = vsyncpa [#allocation4], 1 }

</bundles_post_ra>
